<compile_context>
chip_gen: v7x
topology: tpu7x:2x2x1
jax: 0.10.0
libtpu: 0.0.40
codegen_flags: <defaults>
</compile_context>

<pallas_src>
import functools

import jax
import jax.numpy as jnp
from jax import lax
from jax.experimental import pallas as pl
from jax.experimental.pallas import tpu as pltpu


# ----------------------------------------------------------------------------
# Fused kernel: input projection + GRU recurrence + attention + FC + sigmoid
# ----------------------------------------------------------------------------
def fused_gru_attn_fc_kernel(
    x_ref,       # (T, Bb, I)  one batch block, time-major
    w_ih_ref,    # (I, 3H)     gate order [r, z, n], pre-transposed+concatenated
    b_ih_ref,    # (1, 3H)
    w_hh_ref,    # (H, 3H)
    b_hh_ref,    # (1, 3H)
    w_attn_ref,  # (H, H)
    b_attn_ref,  # (1, H)
    v_attn_ref,  # (1, H)
    w_fc_ref,    # (H, O)
    b_fc_ref,    # (1, O)
    y_ref,       # (Bb, O)
    gi_ref,      # (T*Bb, 3H)  f32 scratch: hoisted input projection
    h_hist_ref,  # (T*Bb, H)   f32 scratch: hidden-state history
    *, seq_len, block_batch, hidden, input_size,
):
    T, Bb, H, I = seq_len, block_batch, hidden, input_size
    f32 = jnp.float32

    # ---- Prologue: input projection for ALL timesteps as ONE fused matmul.
    x2 = x_ref[...].reshape(T * Bb, I)                                  # (T*Bb, I)
    gi_ref[...] = (
        jnp.dot(x2, w_ih_ref[...], preferred_element_type=f32) + b_ih_ref[...]
    )

    # Hoist recurrent weights / biases out of the time loop.
    w_hh = w_hh_ref[...]                                                # (H, 3H)
    b_hh = b_hh_ref[...]                                                # (1, 3H)

    # ---- Sequential GRU recurrence (PyTorch nn.GRU gate order [r, z, n]).
    def step(t, h_prev):
        row = pl.multiple_of(t * Bb, Bb)                # sublane-aligned slice
        gi = gi_ref[pl.ds(row, Bb), :]                  # (Bb, 3H)
        gh = jnp.dot(h_prev, w_hh, preferred_element_type=f32) + b_hh  # (Bb, 3H)
        # Fused sigmoid over the [r, z] lanes; tanh over the n lanes.
        rz = jax.nn.sigmoid(gi[:, : 2 * H] + gh[:, : 2 * H])           # (Bb, 2H)
        r = rz[:, :H]
        z = rz[:, H:]
        n = jnp.tanh(gi[:, 2 * H:] + r * gh[:, 2 * H:])
        h_new = (1.0 - z) * n + z * h_prev
        h_hist_ref[pl.ds(row, Bb), :] = h_new
        return h_new

    unroll = True if T <= 8 else 8                      # bounded unroll for big T
    lax.fori_loop(0, T, step, jnp.zeros((Bb, H), f32), unroll=unroll)

    # ---- Epilogue: additive attention pooling (array-form) + FC + sigmoid.
    h_all = h_hist_ref[...]                                             # (T*Bb, H)
    e = jnp.tanh(
        jnp.dot(h_all, w_attn_ref[...], preferred_element_type=f32)
        + b_attn_ref[...]
    )                                                                   # (T*Bb, H)
    h3 = h_all.reshape(T, Bb, H)
    e3 = e.reshape(T, Bb, H)
    # Scores: VPU multiply + lane reduction (no N=1 MXU matmul).
    s = jnp.sum(e3 * v_attn_ref[...], axis=-1, keepdims=True)           # (T, Bb, 1)

    # Softmax over time (axis 0) in array form — O(1) code in T.
    m = jnp.max(s, axis=0, keepdims=True)                               # (1, Bb, 1)
    p = jnp.exp(s - m)                                                  # (T, Bb, 1)
    denom = jnp.sum(p, axis=0, keepdims=True)                           # (1, Bb, 1)
    alpha = p * pl.reciprocal(denom, approx=True)                       # (T, Bb, 1)

    context = jnp.sum(alpha * h3, axis=0)                               # (Bb, H)

    logits = (
        jnp.dot(context, w_fc_ref[...], preferred_element_type=f32) + b_fc_ref[...]
    )
    y_ref[...] = jax.nn.sigmoid(logits).astype(y_ref.dtype)


# ----------------------------------------------------------------------------
# Wrapper
# ----------------------------------------------------------------------------
def gru_model_forward(x_bti, params):
    B, T, I = x_bti.shape
    H = params["w_hh"].shape[0]
    O = params["w_fc"].shape[-1]
    Bb = 8                                            # batch rows per grid step
    Bp = max(Bb, -(-B // Bb) * Bb)                    # pad batch to sublane mult
    n_blocks = Bp // Bb

    # Boundary-layout plumbing only (tiny tensors): pad batch, go time-major.
    x_pad = jnp.pad(x_bti.astype(jnp.float32), ((0, Bp - B), (0, 0), (0, 0)))
    x_tm = jnp.transpose(x_pad, (1, 0, 2))            # (T, Bp, I)

    kernel = functools.partial(
        fused_gru_attn_fc_kernel,
        seq_len=T, block_batch=Bb, hidden=H, input_size=I)

    def full_spec(a):
        nd = a.ndim
        return pl.BlockSpec(a.shape, lambda i, _nd=nd: (0,) * _nd)

    # VMEM budget: x block (double-buffered) + scratch + epilogue temps + weights.
    f = 4
    est = (
        2 * T * Bb * I * f
        + T * Bb * (3 * H + H) * f
        + 3 * T * Bb * H * f
        + 2 * (I * 3 * H + H * 3 * H + H * H + H * O + 8 * H + O) * f
    )
    vmem_limit = int(min(100 * 2**20, max(16 * 2**20, 2 * est)))

    y_pad = pl.pallas_call(
        kernel,
        out_shape=jax.ShapeDtypeStruct((Bp, O), jnp.float32),
        grid_spec=pltpu.PrefetchScalarGridSpec(
            num_scalar_prefetch=0,
            grid=(n_blocks,),
            in_specs=[
                pl.BlockSpec((T, Bb, I), lambda i: (0, i, 0)),   # x batch block
                full_spec(params["w_ih"]), full_spec(params["b_ih"]),
                full_spec(params["w_hh"]), full_spec(params["b_hh"]),
                full_spec(params["w_attn"]), full_spec(params["b_attn"]),
                full_spec(params["v_attn"]),
                full_spec(params["w_fc"]), full_spec(params["b_fc"]),
            ],
            out_specs=pl.BlockSpec((Bb, O), lambda i: (i, 0)),
            scratch_shapes=[
                pltpu.VMEM((T * Bb, 3 * H), jnp.float32),   # fused gate inputs
                pltpu.VMEM((T * Bb, H), jnp.float32),       # hidden history
            ],
        ),
        compiler_params=pltpu.CompilerParams(
            dimension_semantics=("parallel",),    # batch blocks -> megacore on v7x
            vmem_limit_bytes=vmem_limit,
        ),
    )(x_tm, params["w_ih"], params["b_ih"], params["w_hh"], params["b_hh"],
      params["w_attn"], params["b_attn"], params["v_attn"],
      params["w_fc"], params["b_fc"])
    return y_pad[:B]


def init_params(key, input_size, hidden_size, output_size):
    ks = jax.random.split(key, 9)
    s = 1.0 / float(hidden_size) ** 0.5
    u = lambda k, shape: jax.random.uniform(k, shape, jnp.float32, -s, s)
    return {
        # nn.GRU weight_ih_l0 is (3H, I) in gate order [r, z, n]; stored here
        # pre-transposed and lane-concatenated: (I, 3H) / (H, 3H).
        "w_ih": u(ks[0], (input_size, 3 * hidden_size)),
        "w_hh": u(ks[1], (hidden_size, 3 * hidden_size)),
        "b_ih": u(ks[2], (1, 3 * hidden_size)),
        "b_hh": u(ks[3], (1, 3 * hidden_size)),
        # additive attention: W (H,H), b (1,H), v (1,H) (row vector, VPU path)
        "w_attn": u(ks[4], (hidden_size, hidden_size)),
        "b_attn": u(ks[5], (1, hidden_size)),
        "v_attn": u(ks[6], (1, hidden_size)),
        # nn.Linear(hidden, output): weight (O,H) stored transposed as (H,O)
        "w_fc": u(ks[7], (hidden_size, output_size)),
        "b_fc": u(ks[8], (1, output_size)),
    }


if __name__ == "__main__":
    B, T, I, H, O = 2, 8, 16, 32, 4
    key = jax.random.PRNGKey(0)
    k_x, k_p = jax.random.split(key)
    x = jax.random.normal(k_x, (B, T, I), jnp.float32)
    params = init_params(k_p, I, H, O)

    y = jax.jit(gru_model_forward)(x, params)
    jax.block_until_ready(y)
    assert y.shape == (B, O) and y.dtype == jnp.float32
    assert bool(jnp.all(jnp.isfinite(y)))
    assert bool(jnp.all((y >= 0.0) & (y <= 1.0)))
    print("KERNEL_OK")
</pallas_src>

<mosaic_0001>
module attributes {stable_mosaic.version = 11 : i64} {
  func.func @fused_gru_attn_fc_kernel(%arg0: i32, %arg1: memref<8x8x16xf32, #tpu.memory_space<vmem>>, %arg2: memref<16x96xf32, #tpu.memory_space<vmem>>, %arg3: memref<1x96xf32, #tpu.memory_space<vmem>>, %arg4: memref<32x96xf32, #tpu.memory_space<vmem>>, %arg5: memref<1x96xf32, #tpu.memory_space<vmem>>, %arg6: memref<32x32xf32, #tpu.memory_space<vmem>>, %arg7: memref<1x32xf32, #tpu.memory_space<vmem>>, %arg8: memref<1x32xf32, #tpu.memory_space<vmem>>, %arg9: memref<32x4xf32, #tpu.memory_space<vmem>>, %arg10: memref<1x4xf32, #tpu.memory_space<vmem>>, %arg11: memref<8x4xf32, #tpu.memory_space<vmem>>, %arg12: memref<64x96xf32, #tpu.memory_space<vmem>>, %arg13: memref<64x32xf32, #tpu.memory_space<vmem>>) attributes {dimension_semantics = [#tpu.dimension_semantics<parallel>], iteration_bounds = array<i64: 1>, scalar_prefetch = 0 : i64, scratch_operands = 2 : i64, tpu.core_type = #tpu.core_type<tc>, window_params = [{transform_indices = @transform_0, window_bounds = array<i64: 8, 8, 16>}, {pipeline_mode = #tpu.pipeline_mode<synchronous>, transform_indices = @transform_1, window_bounds = array<i64: 16, 96>}, {pipeline_mode = #tpu.pipeline_mode<synchronous>, transform_indices = @transform_2, window_bounds = array<i64: 1, 96>}, {pipeline_mode = #tpu.pipeline_mode<synchronous>, transform_indices = @transform_3, window_bounds = array<i64: 32, 96>}, {pipeline_mode = #tpu.pipeline_mode<synchronous>, transform_indices = @transform_4, window_bounds = array<i64: 1, 96>}, {pipeline_mode = #tpu.pipeline_mode<synchronous>, transform_indices = @transform_5, window_bounds = array<i64: 32, 32>}, {pipeline_mode = #tpu.pipeline_mode<synchronous>, transform_indices = @transform_6, window_bounds = array<i64: 1, 32>}, {pipeline_mode = #tpu.pipeline_mode<synchronous>, transform_indices = @transform_7, window_bounds = array<i64: 1, 32>}, {pipeline_mode = #tpu.pipeline_mode<synchronous>, transform_indices = @transform_8, window_bounds = array<i64: 32, 4>}, {pipeline_mode = #tpu.pipeline_mode<synchronous>, transform_indices = @transform_9, window_bounds = array<i64: 1, 4>}, {transform_indices = @transform_10, window_bounds = array<i64: 8, 4>}]} {
    %c0 = arith.constant 0 : index
    %c0_0 = arith.constant 0 : index
    %c0_1 = arith.constant 0 : index
    %0 = vector.load %arg1[%c0, %c0_0, %c0_1] : memref<8x8x16xf32, #tpu.memory_space<vmem>>, vector<8x8x16xf32>
    %1 = vector.shape_cast %0 : vector<8x8x16xf32> to vector<64x16xf32>
    %c0_2 = arith.constant 0 : index
    %c0_3 = arith.constant 0 : index
    %2 = vector.load %arg2[%c0_2, %c0_3] : memref<16x96xf32, #tpu.memory_space<vmem>>, vector<16x96xf32>
    %cst = arith.constant dense<0.000000e+00> : vector<64x96xf32>
    %3 = tpu.matmul %1, %2, %cst {dimension_numbers = #tpu.dot_dimension_numbers<[1], [0], [0], [1], [0, 0, 1, 1], [], []>} : vector<64x16xf32>, vector<16x96xf32>, vector<64x96xf32> -> vector<64x96xf32>
    %c0_4 = arith.constant 0 : index
    %c0_5 = arith.constant 0 : index
    %4 = vector.load %arg3[%c0_4, %c0_5] : memref<1x96xf32, #tpu.memory_space<vmem>>, vector<1x96xf32>
    %5 = vector.broadcast %4 : vector<1x96xf32> to vector<64x96xf32>
    %6 = arith.addf %3, %5 : vector<64x96xf32>
    %c0_6 = arith.constant 0 : index
    %c0_7 = arith.constant 0 : index
    %7 = vector.load %arg12[%c0_6, %c0_7] : memref<64x96xf32, #tpu.memory_space<vmem>>, vector<64x96xf32>
    tpu.vector_store %arg12[%c0_6, %c0_7], %6 {strides = array<i32>} : memref<64x96xf32, #tpu.memory_space<vmem>>, vector<64x96xf32>,
    %c0_8 = arith.constant 0 : index
    %c0_9 = arith.constant 0 : index
    %8 = vector.load %arg4[%c0_8, %c0_9] : memref<32x96xf32, #tpu.memory_space<vmem>>, vector<32x96xf32>
    %c0_10 = arith.constant 0 : index
    %c0_11 = arith.constant 0 : index
    %9 = vector.load %arg5[%c0_10, %c0_11] : memref<1x96xf32, #tpu.memory_space<vmem>>, vector<1x96xf32>
    %cst_12 = arith.constant 0.000000e+00 : f32
    %10 = vector.broadcast %cst_12 : f32 to vector<8x32xf32>
    %c0_i32 = arith.constant 0 : i32
    %c8_i32 = arith.constant 8 : i32
    %11 = arith.muli %c0_i32, %c8_i32 : i32
    %12 = tpu.assume_multiple %11, 8 : i32
    %13 = arith.index_cast %12 : i32 to index
    %c0_13 = arith.constant 0 : index
    %14 = vector.load %arg12[%13, %c0_13] : memref<64x96xf32, #tpu.memory_space<vmem>>, vector<8x96xf32>
    %cst_14 = arith.constant dense<0.000000e+00> : vector<8x96xf32>
    %15 = tpu.matmul %10, %8, %cst_14 {dimension_numbers = #tpu.dot_dimension_numbers<[1], [0], [0], [1], [0, 0, 1, 1], [], []>} : vector<8x32xf32>, vector<32x96xf32>, vector<8x96xf32> -> vector<8x96xf32>
    %16 = vector.broadcast %9 : vector<1x96xf32> to vector<8x96xf32>
    %17 = arith.addf %15, %16 : vector<8x96xf32>
    %18 = vector.extract_strided_slice %14 {offsets = [0, 0], sizes = [8, 64], strides = [1, 1]} : vector<8x96xf32> to vector<8x64xf32>
    %19 = vector.extract_strided_slice %17 {offsets = [0, 0], sizes = [8, 64], strides = [1, 1]} : vector<8x96xf32> to vector<8x64xf32>
    %20 = arith.addf %18, %19 : vector<8x64xf32>
    %21 = arith.negf %20 : vector<8x64xf32>
    %22 = math.exp %21 : vector<8x64xf32>
    %cst_15 = arith.constant 1.000000e+00 : f32
    %23 = vector.broadcast %cst_15 : f32 to vector<8x64xf32>
    %24 = arith.addf %23, %22 : vector<8x64xf32>
    %25 = arith.divf %23, %24 : vector<8x64xf32>
    %26 = vector.extract_strided_slice %25 {offsets = [0, 0], sizes = [8, 32], strides = [1, 1]} : vector<8x64xf32> to vector<8x32xf32>
    %27 = vector.extract_strided_slice %25 {offsets = [0, 32], sizes = [8, 32], strides = [1, 1]} : vector<8x64xf32> to vector<8x32xf32>
    %28 = vector.extract_strided_slice %14 {offsets = [0, 64], sizes = [8, 32], strides = [1, 1]} : vector<8x96xf32> to vector<8x32xf32>
    %29 = vector.extract_strided_slice %17 {offsets = [0, 64], sizes = [8, 32], strides = [1, 1]} : vector<8x96xf32> to vector<8x32xf32>
    %30 = arith.mulf %26, %29 : vector<8x32xf32>
    %31 = arith.addf %28, %30 : vector<8x32xf32>
    %32 = math.tanh %31 : vector<8x32xf32>
    %cst_16 = arith.constant 1.000000e+00 : f32
    %33 = vector.broadcast %cst_16 : f32 to vector<8x32xf32>
    %34 = arith.subf %33, %27 : vector<8x32xf32>
    %35 = arith.mulf %34, %32 : vector<8x32xf32>
    %36 = arith.mulf %27, %10 : vector<8x32xf32>
    %37 = arith.addf %35, %36 : vector<8x32xf32>
    %38 = arith.index_cast %12 : i32 to index
    %c0_17 = arith.constant 0 : index
    %39 = vector.load %arg13[%38, %c0_17] : memref<64x32xf32, #tpu.memory_space<vmem>>, vector<8x32xf32>
    tpu.vector_store %arg13[%38, %c0_17], %37 {strides = array<i32>} : memref<64x32xf32, #tpu.memory_space<vmem>>, vector<8x32xf32>,
    %c1_i32 = arith.constant 1 : i32
    %c8_i32_18 = arith.constant 8 : i32
    %40 = arith.muli %c1_i32, %c8_i32_18 : i32
    %41 = tpu.assume_multiple %40, 8 : i32
    %42 = arith.index_cast %41 : i32 to index
    %c0_19 = arith.constant 0 : index
    %43 = vector.load %arg12[%42, %c0_19] : memref<64x96xf32, #tpu.memory_space<vmem>>, vector<8x96xf32>
    %cst_20 = arith.constant dense<0.000000e+00> : vector<8x96xf32>
    %44 = tpu.matmul %37, %8, %cst_20 {dimension_numbers = #tpu.dot_dimension_numbers<[1], [0], [0], [1], [0, 0, 1, 1], [], []>} : vector<8x32xf32>, vector<32x96xf32>, vector<8x96xf32> -> vector<8x96xf32>
    %45 = vector.broadcast %9 : vector<1x96xf32> to vector<8x96xf32>
    %46 = arith.addf %44, %45 : vector<8x96xf32>
    %47 = vector.extract_strided_slice %43 {offsets = [0, 0], sizes = [8, 64], strides = [1, 1]} : vector<8x96xf32> to vector<8x64xf32>
    %48 = vector.extract_strided_slice %46 {offsets = [0, 0], sizes = [8, 64], strides = [1, 1]} : vector<8x96xf32> to vector<8x64xf32>
    %49 = arith.addf %47, %48 : vector<8x64xf32>
    %50 = arith.negf %49 : vector<8x64xf32>
    %51 = math.exp %50 : vector<8x64xf32>
    %cst_21 = arith.constant 1.000000e+00 : f32
    %52 = vector.broadcast %cst_21 : f32 to vector<8x64xf32>
    %53 = arith.addf %52, %51 : vector<8x64xf32>
    %54 = arith.divf %52, %53 : vector<8x64xf32>
    %55 = vector.extract_strided_slice %54 {offsets = [0, 0], sizes = [8, 32], strides = [1, 1]} : vector<8x64xf32> to vector<8x32xf32>
    %56 = vector.extract_strided_slice %54 {offsets = [0, 32], sizes = [8, 32], strides = [1, 1]} : vector<8x64xf32> to vector<8x32xf32>
    %57 = vector.extract_strided_slice %43 {offsets = [0, 64], sizes = [8, 32], strides = [1, 1]} : vector<8x96xf32> to vector<8x32xf32>
    %58 = vector.extract_strided_slice %46 {offsets = [0, 64], sizes = [8, 32], strides = [1, 1]} : vector<8x96xf32> to vector<8x32xf32>
    %59 = arith.mulf %55, %58 : vector<8x32xf32>
    %60 = arith.addf %57, %59 : vector<8x32xf32>
    %61 = math.tanh %60 : vector<8x32xf32>
    %cst_22 = arith.constant 1.000000e+00 : f32
    %62 = vector.broadcast %cst_22 : f32 to vector<8x32xf32>
    %63 = arith.subf %62, %56 : vector<8x32xf32>
    %64 = arith.mulf %63, %61 : vector<8x32xf32>
    %65 = arith.mulf %56, %37 : vector<8x32xf32>
    %66 = arith.addf %64, %65 : vector<8x32xf32>
    %67 = arith.index_cast %41 : i32 to index
    %c0_23 = arith.constant 0 : index
    %68 = vector.load %arg13[%67, %c0_23] : memref<64x32xf32, #tpu.memory_space<vmem>>, vector<8x32xf32>
    tpu.vector_store %arg13[%67, %c0_23], %66 {strides = array<i32>} : memref<64x32xf32, #tpu.memory_space<vmem>>, vector<8x32xf32>,
    %c2_i32 = arith.constant 2 : i32
    %c8_i32_24 = arith.constant 8 : i32
    %69 = arith.muli %c2_i32, %c8_i32_24 : i32
    %70 = tpu.assume_multiple %69, 8 : i32
    %71 = arith.index_cast %70 : i32 to index
    %c0_25 = arith.constant 0 : index
    %72 = vector.load %arg12[%71, %c0_25] : memref<64x96xf32, #tpu.memory_space<vmem>>, vector<8x96xf32>
    %cst_26 = arith.constant dense<0.000000e+00> : vector<8x96xf32>
    %73 = tpu.matmul %66, %8, %cst_26 {dimension_numbers = #tpu.dot_dimension_numbers<[1], [0], [0], [1], [0, 0, 1, 1], [], []>} : vector<8x32xf32>, vector<32x96xf32>, vector<8x96xf32> -> vector<8x96xf32>
    %74 = vector.broadcast %9 : vector<1x96xf32> to vector<8x96xf32>
    %75 = arith.addf %73, %74 : vector<8x96xf32>
    %76 = vector.extract_strided_slice %72 {offsets = [0, 0], sizes = [8, 64], strides = [1, 1]} : vector<8x96xf32> to vector<8x64xf32>
    %77 = vector.extract_strided_slice %75 {offsets = [0, 0], sizes = [8, 64], strides = [1, 1]} : vector<8x96xf32> to vector<8x64xf32>
    %78 = arith.addf %76, %77 : vector<8x64xf32>
    %79 = arith.negf %78 : vector<8x64xf32>
    %80 = math.exp %79 : vector<8x64xf32>
    %cst_27 = arith.constant 1.000000e+00 : f32
    %81 = vector.broadcast %cst_27 : f32 to vector<8x64xf32>
    %82 = arith.addf %81, %80 : vector<8x64xf32>
    %83 = arith.divf %81, %82 : vector<8x64xf32>
    %84 = vector.extract_strided_slice %83 {offsets = [0, 0], sizes = [8, 32], strides = [1, 1]} : vector<8x64xf32> to vector<8x32xf32>
    %85 = vector.extract_strided_slice %83 {offsets = [0, 32], sizes = [8, 32], strides = [1, 1]} : vector<8x64xf32> to vector<8x32xf32>
    %86 = vector.extract_strided_slice %72 {offsets = [0, 64], sizes = [8, 32], strides = [1, 1]} : vector<8x96xf32> to vector<8x32xf32>
    %87 = vector.extract_strided_slice %75 {offsets = [0, 64], sizes = [8, 32], strides = [1, 1]} : vector<8x96xf32> to vector<8x32xf32>
    %88 = arith.mulf %84, %87 : vector<8x32xf32>
    %89 = arith.addf %86, %88 : vector<8x32xf32>
    %90 = math.tanh %89 : vector<8x32xf32>
    %cst_28 = arith.constant 1.000000e+00 : f32
    %91 = vector.broadcast %cst_28 : f32 to vector<8x32xf32>
    %92 = arith.subf %91, %85 : vector<8x32xf32>
    %93 = arith.mulf %92, %90 : vector<8x32xf32>
    %94 = arith.mulf %85, %66 : vector<8x32xf32>
    %95 = arith.addf %93, %94 : vector<8x32xf32>
    %96 = arith.index_cast %70 : i32 to index
    %c0_29 = arith.constant 0 : index
    %97 = vector.load %arg13[%96, %c0_29] : memref<64x32xf32, #tpu.memory_space<vmem>>, vector<8x32xf32>
    tpu.vector_store %arg13[%96, %c0_29], %95 {strides = array<i32>} : memref<64x32xf32, #tpu.memory_space<vmem>>, vector<8x32xf32>,
    %c3_i32 = arith.constant 3 : i32
    %c8_i32_30 = arith.constant 8 : i32
    %98 = arith.muli %c3_i32, %c8_i32_30 : i32
    %99 = tpu.assume_multiple %98, 8 : i32
    %100 = arith.index_cast %99 : i32 to index
    %c0_31 = arith.constant 0 : index
    %101 = vector.load %arg12[%100, %c0_31] : memref<64x96xf32, #tpu.memory_space<vmem>>, vector<8x96xf32>
    %cst_32 = arith.constant dense<0.000000e+00> : vector<8x96xf32>
    %102 = tpu.matmul %95, %8, %cst_32 {dimension_numbers = #tpu.dot_dimension_numbers<[1], [0], [0], [1], [0, 0, 1, 1], [], []>} : vector<8x32xf32>, vector<32x96xf32>, vector<8x96xf32> -> vector<8x96xf32>
    %103 = vector.broadcast %9 : vector<1x96xf32> to vector<8x96xf32>
    %104 = arith.addf %102, %103 : vector<8x96xf32>
    %105 = vector.extract_strided_slice %101 {offsets = [0, 0], sizes = [8, 64], strides = [1, 1]} : vector<8x96xf32> to vector<8x64xf32>
    %106 = vector.extract_strided_slice %104 {offsets = [0, 0], sizes = [8, 64], strides = [1, 1]} : vector<8x96xf32> to vector<8x64xf32>
    %107 = arith.addf %105, %106 : vector<8x64xf32>
    %108 = arith.negf %107 : vector<8x64xf32>
    %109 = math.exp %108 : vector<8x64xf32>
    %cst_33 = arith.constant 1.000000e+00 : f32
    %110 = vector.broadcast %cst_33 : f32 to vector<8x64xf32>
    %111 = arith.addf %110, %109 : vector<8x64xf32>
    %112 = arith.divf %110, %111 : vector<8x64xf32>
    %113 = vector.extract_strided_slice %112 {offsets = [0, 0], sizes = [8, 32], strides = [1, 1]} : vector<8x64xf32> to vector<8x32xf32>
    %114 = vector.extract_strided_slice %112 {offsets = [0, 32], sizes = [8, 32], strides = [1, 1]} : vector<8x64xf32> to vector<8x32xf32>
    %115 = vector.extract_strided_slice %101 {offsets = [0, 64], sizes = [8, 32], strides = [1, 1]} : vector<8x96xf32> to vector<8x32xf32>
    %116 = vector.extract_strided_slice %104 {offsets = [0, 64], sizes = [8, 32], strides = [1, 1]} : vector<8x96xf32> to vector<8x32xf32>
    %117 = arith.mulf %113, %116 : vector<8x32xf32>
    %118 = arith.addf %115, %117 : vector<8x32xf32>
    %119 = math.tanh %118 : vector<8x32xf32>
    %cst_34 = arith.constant 1.000000e+00 : f32
    %120 = vector.broadcast %cst_34 : f32 to vector<8x32xf32>
    %121 = arith.subf %120, %114 : vector<8x32xf32>
    %122 = arith.mulf %121, %119 : vector<8x32xf32>
    %123 = arith.mulf %114, %95 : vector<8x32xf32>
    %124 = arith.addf %122, %123 : vector<8x32xf32>
    %125 = arith.index_cast %99 : i32 to index
    %c0_35 = arith.constant 0 : index
    %126 = vector.load %arg13[%125, %c0_35] : memref<64x32xf32, #tpu.memory_space<vmem>>, vector<8x32xf32>
    tpu.vector_store %arg13[%125, %c0_35], %124 {strides = array<i32>} : memref<64x32xf32, #tpu.memory_space<vmem>>, vector<8x32xf32>,
    %c4_i32 = arith.constant 4 : i32
    %c8_i32_36 = arith.constant 8 : i32
    %127 = arith.muli %c4_i32, %c8_i32_36 : i32
    %128 = tpu.assume_multiple %127, 8 : i32
    %129 = arith.index_cast %128 : i32 to index
    %c0_37 = arith.constant 0 : index
    %130 = vector.load %arg12[%129, %c0_37] : memref<64x96xf32, #tpu.memory_space<vmem>>, vector<8x96xf32>
    %cst_38 = arith.constant dense<0.000000e+00> : vector<8x96xf32>
    %131 = tpu.matmul %124, %8, %cst_38 {dimension_numbers = #tpu.dot_dimension_numbers<[1], [0], [0], [1], [0, 0, 1, 1], [], []>} : vector<8x32xf32>, vector<32x96xf32>, vector<8x96xf32> -> vector<8x96xf32>
    %132 = vector.broadcast %9 : vector<1x96xf32> to vector<8x96xf32>
    %133 = arith.addf %131, %132 : vector<8x96xf32>
    %134 = vector.extract_strided_slice %130 {offsets = [0, 0], sizes = [8, 64], strides = [1, 1]} : vector<8x96xf32> to vector<8x64xf32>
    %135 = vector.extract_strided_slice %133 {offsets = [0, 0], sizes = [8, 64], strides = [1, 1]} : vector<8x96xf32> to vector<8x64xf32>
    %136 = arith.addf %134, %135 : vector<8x64xf32>
    %137 = arith.negf %136 : vector<8x64xf32>
    %138 = math.exp %137 : vector<8x64xf32>
    %cst_39 = arith.constant 1.000000e+00 : f32
    %139 = vector.broadcast %cst_39 : f32 to vector<8x64xf32>
    %140 = arith.addf %139, %138 : vector<8x64xf32>
    %141 = arith.divf %139, %140 : vector<8x64xf32>
    %142 = vector.extract_strided_slice %141 {offsets = [0, 0], sizes = [8, 32], strides = [1, 1]} : vector<8x64xf32> to vector<8x32xf32>
    %143 = vector.extract_strided_slice %141 {offsets = [0, 32], sizes = [8, 32], strides = [1, 1]} : vector<8x64xf32> to vector<8x32xf32>
    %144 = vector.extract_strided_slice %130 {offsets = [0, 64], sizes = [8, 32], strides = [1, 1]} : vector<8x96xf32> to vector<8x32xf32>
    %145 = vector.extract_strided_slice %133 {offsets = [0, 64], sizes = [8, 32], strides = [1, 1]} : vector<8x96xf32> to vector<8x32xf32>
    %146 = arith.mulf %142, %145 : vector<8x32xf32>
    %147 = arith.addf %144, %146 : vector<8x32xf32>
    %148 = math.tanh %147 : vector<8x32xf32>
    %cst_40 = arith.constant 1.000000e+00 : f32
    %149 = vector.broadcast %cst_40 : f32 to vector<8x32xf32>
    %150 = arith.subf %149, %143 : vector<8x32xf32>
    %151 = arith.mulf %150, %148 : vector<8x32xf32>
    %152 = arith.mulf %143, %124 : vector<8x32xf32>
    %153 = arith.addf %151, %152 : vector<8x32xf32>
    %154 = arith.index_cast %128 : i32 to index
    %c0_41 = arith.constant 0 : index
    %155 = vector.load %arg13[%154, %c0_41] : memref<64x32xf32, #tpu.memory_space<vmem>>, vector<8x32xf32>
    tpu.vector_store %arg13[%154, %c0_41], %153 {strides = array<i32>} : memref<64x32xf32, #tpu.memory_space<vmem>>, vector<8x32xf32>,
    %c5_i32 = arith.constant 5 : i32
    %c8_i32_42 = arith.constant 8 : i32
    %156 = arith.muli %c5_i32, %c8_i32_42 : i32
    %157 = tpu.assume_multiple %156, 8 : i32
    %158 = arith.index_cast %157 : i32 to index
    %c0_43 = arith.constant 0 : index
    %159 = vector.load %arg12[%158, %c0_43] : memref<64x96xf32, #tpu.memory_space<vmem>>, vector<8x96xf32>
    %cst_44 = arith.constant dense<0.000000e+00> : vector<8x96xf32>
    %160 = tpu.matmul %153, %8, %cst_44 {dimension_numbers = #tpu.dot_dimension_numbers<[1], [0], [0], [1], [0, 0, 1, 1], [], []>} : vector<8x32xf32>, vector<32x96xf32>, vector<8x96xf32> -> vector<8x96xf32>
    %161 = vector.broadcast %9 : vector<1x96xf32> to vector<8x96xf32>
    %162 = arith.addf %160, %161 : vector<8x96xf32>
    %163 = vector.extract_strided_slice %159 {offsets = [0, 0], sizes = [8, 64], strides = [1, 1]} : vector<8x96xf32> to vector<8x64xf32>
    %164 = vector.extract_strided_slice %162 {offsets = [0, 0], sizes = [8, 64], strides = [1, 1]} : vector<8x96xf32> to vector<8x64xf32>
    %165 = arith.addf %163, %164 : vector<8x64xf32>
    %166 = arith.negf %165 : vector<8x64xf32>
    %167 = math.exp %166 : vector<8x64xf32>
    %cst_45 = arith.constant 1.000000e+00 : f32
    %168 = vector.broadcast %cst_45 : f32 to vector<8x64xf32>
    %169 = arith.addf %168, %167 : vector<8x64xf32>
    %170 = arith.divf %168, %169 : vector<8x64xf32>
    %171 = vector.extract_strided_slice %170 {offsets = [0, 0], sizes = [8, 32], strides = [1, 1]} : vector<8x64xf32> to vector<8x32xf32>
    %172 = vector.extract_strided_slice %170 {offsets = [0, 32], sizes = [8, 32], strides = [1, 1]} : vector<8x64xf32> to vector<8x32xf32>
    %173 = vector.extract_strided_slice %159 {offsets = [0, 64], sizes = [8, 32], strides = [1, 1]} : vector<8x96xf32> to vector<8x32xf32>
    %174 = vector.extract_strided_slice %162 {offsets = [0, 64], sizes = [8, 32], strides = [1, 1]} : vector<8x96xf32> to vector<8x32xf32>
    %175 = arith.mulf %171, %174 : vector<8x32xf32>
    %176 = arith.addf %173, %175 : vector<8x32xf32>
    %177 = math.tanh %176 : vector<8x32xf32>
    %cst_46 = arith.constant 1.000000e+00 : f32
    %178 = vector.broadcast %cst_46 : f32 to vector<8x32xf32>
    %179 = arith.subf %178, %172 : vector<8x32xf32>
    %180 = arith.mulf %179, %177 : vector<8x32xf32>
    %181 = arith.mulf %172, %153 : vector<8x32xf32>
    %182 = arith.addf %180, %181 : vector<8x32xf32>
    %183 = arith.index_cast %157 : i32 to index
    %c0_47 = arith.constant 0 : index
    %184 = vector.load %arg13[%183, %c0_47] : memref<64x32xf32, #tpu.memory_space<vmem>>, vector<8x32xf32>
    tpu.vector_store %arg13[%183, %c0_47], %182 {strides = array<i32>} : memref<64x32xf32, #tpu.memory_space<vmem>>, vector<8x32xf32>,
    %c6_i32 = arith.constant 6 : i32
    %c8_i32_48 = arith.constant 8 : i32
    %185 = arith.muli %c6_i32, %c8_i32_48 : i32
    %186 = tpu.assume_multiple %185, 8 : i32
    %187 = arith.index_cast %186 : i32 to index
    %c0_49 = arith.constant 0 : index
    %188 = vector.load %arg12[%187, %c0_49] : memref<64x96xf32, #tpu.memory_space<vmem>>, vector<8x96xf32>
    %cst_50 = arith.constant dense<0.000000e+00> : vector<8x96xf32>
    %189 = tpu.matmul %182, %8, %cst_50 {dimension_numbers = #tpu.dot_dimension_numbers<[1], [0], [0], [1], [0, 0, 1, 1], [], []>} : vector<8x32xf32>, vector<32x96xf32>, vector<8x96xf32> -> vector<8x96xf32>
    %190 = vector.broadcast %9 : vector<1x96xf32> to vector<8x96xf32>
    %191 = arith.addf %189, %190 : vector<8x96xf32>
    %192 = vector.extract_strided_slice %188 {offsets = [0, 0], sizes = [8, 64], strides = [1, 1]} : vector<8x96xf32> to vector<8x64xf32>
    %193 = vector.extract_strided_slice %191 {offsets = [0, 0], sizes = [8, 64], strides = [1, 1]} : vector<8x96xf32> to vector<8x64xf32>
    %194 = arith.addf %192, %193 : vector<8x64xf32>
    %195 = arith.negf %194 : vector<8x64xf32>
    %196 = math.exp %195 : vector<8x64xf32>
    %cst_51 = arith.constant 1.000000e+00 : f32
    %197 = vector.broadcast %cst_51 : f32 to vector<8x64xf32>
    %198 = arith.addf %197, %196 : vector<8x64xf32>
    %199 = arith.divf %197, %198 : vector<8x64xf32>
    %200 = vector.extract_strided_slice %199 {offsets = [0, 0], sizes = [8, 32], strides = [1, 1]} : vector<8x64xf32> to vector<8x32xf32>
    %201 = vector.extract_strided_slice %199 {offsets = [0, 32], sizes = [8, 32], strides = [1, 1]} : vector<8x64xf32> to vector<8x32xf32>
    %202 = vector.extract_strided_slice %188 {offsets = [0, 64], sizes = [8, 32], strides = [1, 1]} : vector<8x96xf32> to vector<8x32xf32>
    %203 = vector.extract_strided_slice %191 {offsets = [0, 64], sizes = [8, 32], strides = [1, 1]} : vector<8x96xf32> to vector<8x32xf32>
    %204 = arith.mulf %200, %203 : vector<8x32xf32>
    %205 = arith.addf %202, %204 : vector<8x32xf32>
    %206 = math.tanh %205 : vector<8x32xf32>
    %cst_52 = arith.constant 1.000000e+00 : f32
    %207 = vector.broadcast %cst_52 : f32 to vector<8x32xf32>
    %208 = arith.subf %207, %201 : vector<8x32xf32>
    %209 = arith.mulf %208, %206 : vector<8x32xf32>
    %210 = arith.mulf %201, %182 : vector<8x32xf32>
    %211 = arith.addf %209, %210 : vector<8x32xf32>
    %212 = arith.index_cast %186 : i32 to index
    %c0_53 = arith.constant 0 : index
    %213 = vector.load %arg13[%212, %c0_53] : memref<64x32xf32, #tpu.memory_space<vmem>>, vector<8x32xf32>
    tpu.vector_store %arg13[%212, %c0_53], %211 {strides = array<i32>} : memref<64x32xf32, #tpu.memory_space<vmem>>, vector<8x32xf32>,
    %c7_i32 = arith.constant 7 : i32
    %c8_i32_54 = arith.constant 8 : i32
    %214 = arith.muli %c7_i32, %c8_i32_54 : i32
    %215 = tpu.assume_multiple %214, 8 : i32
    %216 = arith.index_cast %215 : i32 to index
    %c0_55 = arith.constant 0 : index
    %217 = vector.load %arg12[%216, %c0_55] : memref<64x96xf32, #tpu.memory_space<vmem>>, vector<8x96xf32>
    %cst_56 = arith.constant dense<0.000000e+00> : vector<8x96xf32>
    %218 = tpu.matmul %211, %8, %cst_56 {dimension_numbers = #tpu.dot_dimension_numbers<[1], [0], [0], [1], [0, 0, 1, 1], [], []>} : vector<8x32xf32>, vector<32x96xf32>, vector<8x96xf32> -> vector<8x96xf32>
    %219 = vector.broadcast %9 : vector<1x96xf32> to vector<8x96xf32>
    %220 = arith.addf %218, %219 : vector<8x96xf32>
    %221 = vector.extract_strided_slice %217 {offsets = [0, 0], sizes = [8, 64], strides = [1, 1]} : vector<8x96xf32> to vector<8x64xf32>
    %222 = vector.extract_strided_slice %220 {offsets = [0, 0], sizes = [8, 64], strides = [1, 1]} : vector<8x96xf32> to vector<8x64xf32>
    %223 = arith.addf %221, %222 : vector<8x64xf32>
    %224 = arith.negf %223 : vector<8x64xf32>
    %225 = math.exp %224 : vector<8x64xf32>
    %cst_57 = arith.constant 1.000000e+00 : f32
    %226 = vector.broadcast %cst_57 : f32 to vector<8x64xf32>
    %227 = arith.addf %226, %225 : vector<8x64xf32>
    %228 = arith.divf %226, %227 : vector<8x64xf32>
    %229 = vector.extract_strided_slice %228 {offsets = [0, 0], sizes = [8, 32], strides = [1, 1]} : vector<8x64xf32> to vector<8x32xf32>
    %230 = vector.extract_strided_slice %228 {offsets = [0, 32], sizes = [8, 32], strides = [1, 1]} : vector<8x64xf32> to vector<8x32xf32>
    %231 = vector.extract_strided_slice %217 {offsets = [0, 64], sizes = [8, 32], strides = [1, 1]} : vector<8x96xf32> to vector<8x32xf32>
    %232 = vector.extract_strided_slice %220 {offsets = [0, 64], sizes = [8, 32], strides = [1, 1]} : vector<8x96xf32> to vector<8x32xf32>
    %233 = arith.mulf %229, %232 : vector<8x32xf32>
    %234 = arith.addf %231, %233 : vector<8x32xf32>
    %235 = math.tanh %234 : vector<8x32xf32>
    %cst_58 = arith.constant 1.000000e+00 : f32
    %236 = vector.broadcast %cst_58 : f32 to vector<8x32xf32>
    %237 = arith.subf %236, %230 : vector<8x32xf32>
    %238 = arith.mulf %237, %235 : vector<8x32xf32>
    %239 = arith.mulf %230, %211 : vector<8x32xf32>
    %240 = arith.addf %238, %239 : vector<8x32xf32>
    %241 = arith.index_cast %215 : i32 to index
    %c0_59 = arith.constant 0 : index
    %242 = vector.load %arg13[%241, %c0_59] : memref<64x32xf32, #tpu.memory_space<vmem>>, vector<8x32xf32>
    tpu.vector_store %arg13[%241, %c0_59], %240 {strides = array<i32>} : memref<64x32xf32, #tpu.memory_space<vmem>>, vector<8x32xf32>,
    %c8_i32_60 = arith.constant 8 : i32
    %c0_61 = arith.constant 0 : index
    %c0_62 = arith.constant 0 : index
    %243 = vector.load %arg13[%c0_61, %c0_62] : memref<64x32xf32, #tpu.memory_space<vmem>>, vector<64x32xf32>
    %c0_63 = arith.constant 0 : index
    %c0_64 = arith.constant 0 : index
    %244 = vector.load %arg6[%c0_63, %c0_64] : memref<32x32xf32, #tpu.memory_space<vmem>>, vector<32x32xf32>
    %cst_65 = arith.constant dense<0.000000e+00> : vector<64x32xf32>
    %245 = tpu.matmul %243, %244, %cst_65 {dimension_numbers = #tpu.dot_dimension_numbers<[1], [0], [0], [1], [0, 0, 1, 1], [], []>} : vector<64x32xf32>, vector<32x32xf32>, vector<64x32xf32> -> vector<64x32xf32>
    %c0_66 = arith.constant 0 : index
    %c0_67 = arith.constant 0 : index
    %246 = vector.load %arg7[%c0_66, %c0_67] : memref<1x32xf32, #tpu.memory_space<vmem>>, vector<1x32xf32>
    %247 = vector.broadcast %246 : vector<1x32xf32> to vector<64x32xf32>
    %248 = arith.addf %245, %247 : vector<64x32xf32>
    %249 = math.tanh %248 : vector<64x32xf32>
    %250 = vector.shape_cast %243 : vector<64x32xf32> to vector<8x8x32xf32>
    %251 = vector.shape_cast %249 : vector<64x32xf32> to vector<8x8x32xf32>
    %c0_68 = arith.constant 0 : index
    %c0_69 = arith.constant 0 : index
    %252 = vector.load %arg8[%c0_68, %c0_69] : memref<1x32xf32, #tpu.memory_space<vmem>>, vector<1x32xf32>
    %253 = vector.shape_cast %252 : vector<1x32xf32> to vector<1x1x32xf32>
    %254 = vector.broadcast %253 : vector<1x1x32xf32> to vector<8x8x32xf32>
    %255 = arith.mulf %251, %254 : vector<8x8x32xf32>
    %cst_70 = arith.constant dense<0.000000e+00> : vector<8x8xf32>
    %256 = vector.multi_reduction <add>, %255, %cst_70 [2] : vector<8x8x32xf32> to vector<8x8xf32>
    %257 = vector.shape_cast %256 : vector<8x8xf32> to vector<8x8x1xf32>
    %cst_71 = arith.constant dense<0xFF800000> : vector<8x1xf32>
    %258 = vector.multi_reduction <maximumf>, %257, %cst_71 [0] : vector<8x8x1xf32> to vector<8x1xf32>
    %259 = vector.shape_cast %258 : vector<8x1xf32> to vector<1x8x1xf32>
    %260 = vector.broadcast %259 : vector<1x8x1xf32> to vector<8x8x1xf32>
    %261 = arith.subf %257, %260 : vector<8x8x1xf32>
    %262 = math.exp %261 : vector<8x8x1xf32>
    %cst_72 = arith.constant dense<0.000000e+00> : vector<8x1xf32>
    %263 = vector.multi_reduction <add>, %262, %cst_72 [0] : vector<8x8x1xf32> to vector<8x1xf32>
    %264 = vector.shape_cast %263 : vector<8x1xf32> to vector<1x8x1xf32>
    %265 = tpu.reciprocal %264 {approx = true} : vector<1x8x1xf32> -> vector<1x8x1xf32>
    %266 = vector.broadcast %265 : vector<1x8x1xf32> to vector<8x8x1xf32>
    %267 = arith.mulf %262, %266 : vector<8x8x1xf32>
    %268 = vector.broadcast %267 : vector<8x8x1xf32> to vector<8x8x32xf32>
    %269 = arith.mulf %268, %250 : vector<8x8x32xf32>
    %cst_73 = arith.constant dense<0.000000e+00> : vector<8x32xf32>
    %270 = vector.multi_reduction <add>, %269, %cst_73 [0] : vector<8x8x32xf32> to vector<8x32xf32>
    %c0_74 = arith.constant 0 : index
    %c0_75 = arith.constant 0 : index
    %271 = vector.load %arg9[%c0_74, %c0_75] : memref<32x4xf32, #tpu.memory_space<vmem>>, vector<32x4xf32>
    %cst_76 = arith.constant dense<0.000000e+00> : vector<8x4xf32>
    %272 = tpu.matmul %270, %271, %cst_76 {dimension_numbers = #tpu.dot_dimension_numbers<[1], [0], [0], [1], [0, 0, 1, 1], [], []>} : vector<8x32xf32>, vector<32x4xf32>, vector<8x4xf32> -> vector<8x4xf32>
    %c0_77 = arith.constant 0 : index
    %c0_78 = arith.constant 0 : index
    %273 = vector.load %arg10[%c0_77, %c0_78] : memref<1x4xf32, #tpu.memory_space<vmem>>, vector<1x4xf32>
    %274 = vector.broadcast %273 : vector<1x4xf32> to vector<8x4xf32>
    %275 = arith.addf %272, %274 : vector<8x4xf32>
    %276 = arith.negf %275 : vector<8x4xf32>
    %277 = math.exp %276 : vector<8x4xf32>
    %cst_79 = arith.constant 1.000000e+00 : f32
    %278 = vector.broadcast %cst_79 : f32 to vector<8x4xf32>
    %279 = arith.addf %278, %277 : vector<8x4xf32>
    %280 = arith.divf %278, %279 : vector<8x4xf32>
    %c0_80 = arith.constant 0 : index
    %c0_81 = arith.constant 0 : index
    %281 = vector.load %arg11[%c0_80, %c0_81] : memref<8x4xf32, #tpu.memory_space<vmem>>, vector<8x4xf32>
    tpu.vector_store %arg11[%c0_80, %c0_81], %280 {strides = array<i32>} : memref<8x4xf32, #tpu.memory_space<vmem>>, vector<8x4xf32>,
    return
  }
  func.func @transform_0(%arg0: i32) -> (i32, i32, i32) {
    %c0_i32 = arith.constant 0 : i32
    %c0_i32_0 = arith.constant 0 : i32
    %c0_i32_1 = arith.constant 0 : i32
    return %c0_i32, %arg0, %c0_i32_0 : i32, i32, i32
  }
  func.func @transform_1(%arg0: i32) -> (i32, i32) {
    %c0_i32 = arith.constant 0 : i32
    %c0_i32_0 = arith.constant 0 : i32
    %c0_i32_1 = arith.constant 0 : i32
    return %c0_i32, %c0_i32_0 : i32, i32
  }
  func.func @transform_2(%arg0: i32) -> (i32, i32) {
    %c0_i32 = arith.constant 0 : i32
    %c0_i32_0 = arith.constant 0 : i32
    %c0_i32_1 = arith.constant 0 : i32
    return %c0_i32, %c0_i32_0 : i32, i32
  }
  func.func @transform_3(%arg0: i32) -> (i32, i32) {
    %c0_i32 = arith.constant 0 : i32
    %c0_i32_0 = arith.constant 0 : i32
    %c0_i32_1 = arith.constant 0 : i32
    return %c0_i32, %c0_i32_0 : i32, i32
  }
  func.func @transform_4(%arg0: i32) -> (i32, i32) {
    %c0_i32 = arith.constant 0 : i32
    %c0_i32_0 = arith.constant 0 : i32
    %c0_i32_1 = arith.constant 0 : i32
    return %c0_i32, %c0_i32_0 : i32, i32
  }
  func.func @transform_5(%arg0: i32) -> (i32, i32) {
    %c0_i32 = arith.constant 0 : i32
    %c0_i32_0 = arith.constant 0 : i32
    %c0_i32_1 = arith.constant 0 : i32
    return %c0_i32, %c0_i32_0 : i32, i32
  }
  func.func @transform_6(%arg0: i32) -> (i32, i32) {
    %c0_i32 = arith.constant 0 : i32
    %c0_i32_0 = arith.constant 0 : i32
    %c0_i32_1 = arith.constant 0 : i32
    return %c0_i32, %c0_i32_0 : i32, i32
  }
  func.func @transform_7(%arg0: i32) -> (i32, i32) {
    %c0_i32 = arith.constant 0 : i32
    %c0_i32_0 = arith.constant 0 : i32
    %c0_i32_1 = arith.constant 0 : i32
    return %c0_i32, %c0_i32_0 : i32, i32
  }
  func.func @transform_8(%arg0: i32) -> (i32, i32) {
    %c0_i32 = arith.constant 0 : i32
    %c0_i32_0 = arith.constant 0 : i32
    %c0_i32_1 = arith.constant 0 : i32
    return %c0_i32, %c0_i32_0 : i32, i32
  }
  func.func @transform_9(%arg0: i32) -> (i32, i32) {
    %c0_i32 = arith.constant 0 : i32
    %c0_i32_0 = arith.constant 0 : i32
    %c0_i32_1 = arith.constant 0 : i32
    return %c0_i32, %c0_i32_0 : i32, i32
  }
  func.func @transform_10(%arg0: i32) -> (i32, i32) {
    %c0_i32 = arith.constant 0 : i32
    %c0_i32_0 = arith.constant 0 : i32
    return %arg0, %c0_i32 : i32, i32
  }
}

</mosaic_0001>

<bundles_post_ra>
// kernel: gru_model_forward.1
= control target key start
LH: loop header
LB: loop body
LE: loop exit
PB: predicated region body
PF: predicated region fallthrough
CT: control target
= control target key end

     0   :  { %vm52_vm0 = vcmask 130048   ;;  %v1810_v10 = vmov 0.0|0.0   ;;  %vm1811_vm1 = vmmov 0   ;;  %v1812_v16 = vmov 0.0   ;;  %s1813_s18 = smov 64   ;;  %s2157_s1 = inlined_call_operand.vmem [shape: f32[16,96], index: 1, kind: input, shape index: {}]   ;;  %s2158_s0 = inlined_call_operand.vmem [shape: f32[8,8,16], index: 0, kind: input, shape index: {}]   ;;  %s2159_s3 = inlined_call_operand.vmem [shape: f32[32,96], index: 3, kind: input, shape index: {}]   ;;  %s2160_s2 = inlined_call_operand.vmem [shape: f32[1,96], index: 2, kind: input, shape index: {}]   ;;  %s2161_s4 = inlined_call_operand.vmem [shape: f32[1,96], index: 4, kind: input, shape index: {}]   ;;  %s2162_s5 = inlined_call_operand.vmem [shape: f32[32,32], index: 5, kind: input, shape index: {}]   ;;  %s2163_s6 = inlined_call_operand.vmem [shape: f32[1,32], index: 6, kind: input, shape index: {}]   ;;  %s2164_s7 = inlined_call_operand.vmem [shape: f32[1,32], index: 7, kind: input, shape index: {}]   ;;  %s2165_s8 = inlined_call_operand.vmem [shape: f32[32,4], index: 8, kind: input, shape index: {}]   ;;  %s2166_s9 = inlined_call_operand.vmem [shape: f32[1,4], index: 9, kind: input, shape index: {}]   ;;  %s2167_s10 = inlined_call_operand.vmem [shape: f32[8,4], index: 10, kind: output, shape index: {}]  }
   0x1   :  { %v43_v0 = vld [vmem:[%s2157_s1] sm:$0xff]  ;;  %v44_v1 = vld [vmem:[%s2157_s1 + $0x8] sm:$0xff]  ;;  %v41_v11 = vld [vmem:[%s2158_s0 + $0x30] sm:$0xff]  ;;  %vm182_vm2 = vcmask 785408   ;;  %vm203_vm3 = vcmask 261120   ;;  %vm1405_vm4 = vcmask 31744  }
   0x2   :  { %v35_v2 = vld [vmem:[%s2158_s0] sm:$0xff]  ;;  %v1651_v3 = vpack.c.bf16 %v44_v1, %v43_v0  ;;  %v192_v6 = vld [vmem:[%s2159_s3 + $0x8] sm:$0xff]  ;;  %v193_v12 = vld [vmem:[%s2159_s3 + $0x10] sm:$0xff] }
   0x3   :  { %1520 = vmatprep.mubr.msk.f32.mxu0 %vm52_vm0, %v35_v2  ;;  %v39_v4 = vld [vmem:[%s2158_s0 + $0x20] sm:$0xff]  ;;  %v36_v7 = vld [vmem:[%s2158_s0 + $0x8] sm:$0xff]  ;;  %v194_v13 = vld [vmem:[%s2159_s3 + $0x18] sm:$0xff] }
   0x4   :  { %1526 = vmatprep.mubr.msk.f32.mxu1 %vm52_vm0, %v39_v4  ;;  %v191_v5 = vld [vmem:[%s2159_s3] sm:$0xff]  ;;  %1652 = vmatprep.subr.bf16.mxu0 %v1651_v3  ;;  %v40_v8 = vld [vmem:[%s2158_s0 + $0x28] sm:$0xff]  ;;  %v42_v14 = vld [vmem:[%s2158_s0 + $0x38] sm:$0xff]  ;;  %v1916_v15 = vpack.c.bf16 %v194_v13, %v193_v12 }
   0x5   :  { %1717 = vmatprep.subr.bf16.mxu1 %v1651_v3  ;;  %1654 = vmatpush3.bf16.msra.mxu0 %v1651_v3  ;;  %v1896_v9 = vpack.c.bf16 %v192_v6, %v191_v5  ;;  %v1938_v17 = vld [vmem:[%s2160_s2] ss:$0 sm:$0xff]  ;;  %v37_v0 = vld [vmem:[%s2158_s0 + $0x10] sm:$0xff]  ;;  %v38_v1 = vld [vmem:[%s2158_s0 + $0x18] sm:$0xff] }
   0x6   :  { %1718 = vmatpush3.bf16.msra.mxu1 %v1651_v3  ;;  %1667 = vmatprep.subr.bf16.mxu0 %v1810_v10  ;;  %v1953_v30 = vld [vmem:[%s2161_s4] ss:$0 sm:$0xff]  ;;  %s1814_s4 = smov 96  }
   0x7   :  { %1655 = vmatprep.subr.bf16.mxu1 %v1810_v10 }
   0x8   :  { %1521 = vmatmul.mubr.msk.f32.vlgmr.msra.gmra.mrb[0].mxu0 %vm52_vm0, %v36_v7 }
   0x9   :  { %1527 = vmatmul.mubr.msk.f32.vlgmr.msra.gmra.mrb[0].mxu1 %vm52_vm0, %v40_v8  ;;  %1669 = vmatpush3.bf16.msra.mxu0 %v1896_v9 }
   0xa   :  { %1657 = vmatpush3.bf16.msra.mxu1 %v1896_v9  ;;  %1529 = vmatprep.mubr.msk.f32.mxu1 %vm52_vm0, %v41_v11 }
   0xb   :  { %1658 = vmatprep.subr.bf16.mxu1 %v1810_v10  ;;  %1670 = vmatprep.subr.bf16.mxu0 %v1810_v10 }
   0xc   :  { %1523 = vmatprep.mubr.msk.f32.mxu0 %vm52_vm0, %v37_v0 }
   0xd   :  { %1530 = vmatmul.mubr.msk.f32.gmra.mrb[2].mxu1 %vm52_vm0, %v42_v14  ;;  %1672 = vmatpush3.bf16.msra.mxu0 %v1916_v15 }
   0xe   :  { %1660 = vmatpush3.bf16.msra.mxu1 %v1916_v15  ;;  %1540 = vmatprep.mubr.msk.f32.mxu1 %vm1811_vm1, %v1812_v16 }
   0xf   :  { %1661 = vmatprep.subr.bf16.mxu1 %v1810_v10  ;;  %1679 = vmatprep.subr.bf16.mxu0 %v1810_v10 }
  0x10   :  { %1524 = vmatmul.mubr.msk.f32.gmra.mrb[2].mxu0 %vm52_vm0, %v38_v1 }
  0x11   :  { %1541 = vmatmul.mubr.f32.vlgmr.msra.gmra.mrb[4].mxu1 %v1812_v16  ;;  %1562 = vmatprep.mubr.msk.f32.mxu0 %vm1811_vm1, %v1812_v16 }
  0x12   :  { %1663 = vmatpush3.bf16.msra.mxu1 %v1896_v9  ;;  %1551 = vmatprep.mubr.msk.f32.mxu1 %vm1811_vm1, %v1812_v16 }
  0x13   :  { %1664 = vmatprep.subr.bf16.mxu1 %v1810_v10 }
  0x16   :  { %1666 = vmatpush3.bf16.msra.mxu1 %v1916_v15 }
  0x17   :  { %1673 = vmatprep.subr.bf16.mxu1 %v1810_v10 }
  0xdb   :  { %v1522_v18 = vpop.f32.mrb[0].mxu0 }
  0xdc   :  { %v1528_v19 = vpop.f32.mrb[0].mxu1  ;;  %v149_v20 = vadd.f32 %v1522_v18, %v1938_v17  ;;  %v143_v22 = vpop.f32.mrb[1].mxu0 }
  0xdd   :  { %v169_v21 = vadd.f32 %v1528_v19, %v1938_v17  ;;  %v163_v23 = vpop.f32.mrb[1].mxu1  ;;  %v144_v24 = vadd.f32 %v1938_v17, %v143_v22 }
  0xde   :  { %v164_v25 = vadd.f32 %v1938_v17, %v163_v23  ;;  %184 = vst.msk [vmem:[#allocation2 + $0x8] sm:$0xff] %vm182_vm2, %v149_v20 }
  0xdf   :  { %188 = vst.msk [vmem:[#allocation2 + $0x28] sm:$0xff] %vm182_vm2, %v169_v21  ;;  %183 = vst.msk [vmem:[#allocation2] sm:$0xff] %vm182_vm2, %v144_v24 }
  0xe0   :  { %187 = vst.msk [vmem:[#allocation2 + $0x20] sm:$0xff] %vm182_vm2, %v164_v25  ;;  %v1531_v26 = vpop.f32.mrb[2].mxu1 }
  0xe1   :  { %v179_v27 = vadd.f32 %v1531_v26, %v1938_v17  ;;  %v173_v28 = vpop.f32.mrb[3].mxu1 }
  0xe2   :  { %v174_v29 = vadd.f32 %v1938_v17, %v173_v28 }
  0xe3   :  { %190 = vst.msk [vmem:[#allocation2 + $0x38] sm:$0xff] %vm182_vm2, %v179_v27  ;;  %v1525_v8 = vpop.f32.mrb[2].mxu0 }
  0xe4   :  { %189 = vst.msk [vmem:[#allocation2 + $0x30] sm:$0xff] %vm182_vm2, %v174_v29  ;;  %v273_v31 = vpop.f32.mrb[4].mxu1  ;;  %v159_v11 = vadd.f32 %v1525_v8, %v1938_v17  ;;  %v153_v12 = vpop.f32.mrb[3].mxu0 }
  0xe5   :  { %v274_v32 = vadd.f32 %v1953_v30, %v273_v31  ;;  %v1542_v33 = vpop.f32.mrb[5].mxu1  ;;  %v309_v54 = vld [vmem:[#allocation2 + $0x8] sm:$0xff]  ;;  %v154_v13 = vadd.f32 %v1938_v17, %v153_v12 }
  0xe6   :  { %v196_v34 = vld [vmem:[#allocation2] sm:$0xff]  ;;  %186 = vst.msk [vmem:[#allocation2 + $0x18] sm:$0xff] %vm182_vm2, %v159_v11 }
  0xe7   :  { %285 = vrot.lane.b32.xlu0 %v274_v32, %s1813_s18  ;;  %v277_v35 = vadd.f32 %v274_v32, %v196_v34  ;;  %185 = vst.msk [vmem:[#allocation2 + $0x10] sm:$0xff] %vm182_vm2, %v154_v13 }
  0xe9   :  { %v1421_v36 = vmul.f32 -1.442695, %v277_v35 }
  0xeb   :  { %1724 = vpow2.f32 %v1421_v36 }
  0xee   :  { %v415_v20 = vld [vmem:[#allocation2 + $0x10] sm:$0xff] }
  0xf5   :  { %v1725_v37 = vpop.eup %1724 }
  0xf6   :  { %v281_v38 = vadd.f32 1.0, %v1725_v37 }
  0xf8   :  { %1726 = vrcp.f32 %v281_v38 }
 0x102   :  { %v1727_v39 = vpop.eup %1726 }
 0x103   :  { %v295_v45 = vsub.f32 1.0, %v1727_v39  ;;  %v301_v47 = vmul.f32 0.0, %v1727_v39 }
 0x159   :  { %v286_v40 = vpop.permute.xlu0 %285 }
 0x15a   :  { %v288_v41 = vmul.f32 %v1727_v39, %v286_v40 }
 0x15c   :  { %290 = vrot.lane.b32.xlu0 %v288_v41, %s1813_s18  ;;  %v521_v41 = vld [vmem:[#allocation2 + $0x18] sm:$0xff] }
 0x1ce   :  { %v291_v42 = vpop.permute.xlu0 %290 }
 0x1cf   :  { %v293_v43 = vadd.f32 %v291_v42, %v196_v34 }
 0x1d1   :  { %1728 = vtanh.f32 %v293_v43 }
 0x1db   :  { %v1729_v44 = vpop.eup %1728 }
 0x1dc   :  { %297 = vrot.lane.b32.xlu1 %v1729_v44, %s1814_s4 }
 0x24e   :  { %v298_v46 = vpop.permute.xlu1 %297 }
 0x24f   :  { %v300_v48 = vmul.f32 %v298_v46, %v295_v45 }
 0x251   :  { %v302_v49 = vadd.f32 %v301_v47, %v300_v48 }
 0x253   :  { %304 = vrot.lane.b32.xlu1 %v302_v49, %s1814_s4 }
 0x2c5   :  { %v305_v50 = vpop.permute.xlu1 %304 }
 0x2c6   :  { %307 = vst.msk [vmem:[#allocation3] sm:$0xff] %vm203_vm3, %v305_v50  ;;  %1552 = vmatmul.mubr.msk.f32.vlgmr.msra.gmra.mrb[6].mxu1 %vm203_vm3, %v305_v50 }
 0x2c7   :  { %1675 = vmatpush3.bf16.msra.mxu1 %v1896_v9  ;;  %1573 = vmatprep.mubr.msk.f32.mxu1 %vm1811_vm1, %v1812_v16 }
 0x2c8   :  { %1676 = vmatprep.subr.bf16.mxu1 %v1810_v10 }
 0x2cb   :  { %1678 = vmatpush3.bf16.msra.mxu1 %v1916_v15 }
 0x2cc   :  { %1685 = vmatprep.subr.bf16.mxu1 %v1810_v10 }
 0x399   :  { %v378_v51 = vpop.f32.mrb[6].mxu1 }
 0x39a   :  { %v379_v52 = vadd.f32 %v1953_v30, %v378_v51  ;;  %v1553_v53 = vpop.f32.mrb[7].mxu1 }
 0x39c   :  { %390 = vrot.lane.b32.xlu0 %v379_v52, %s1813_s18  ;;  %v382_v55 = vadd.f32 %v379_v52, %v309_v54 }
 0x39e   :  { %v1423_v56 = vmul.f32 -1.442695, %v382_v55 }
 0x3a0   :  { %1730 = vpow2.f32 %v1423_v56 }
 0x3aa   :  { %v1731_v57 = vpop.eup %1730 }
 0x3ab   :  { %v386_v58 = vadd.f32 1.0, %v1731_v57 }
 0x3ad   :  { %1732 = vrcp.f32 %v386_v58 }
 0x3b7   :  { %v1733_v59 = vpop.eup %1732 }
 0x3b8   :  { %v400_v3 = vsub.f32 1.0, %v1733_v59  ;;  %v406_v5 = vmul.f32 %v1733_v59, %v302_v49 }
 0x40e   :  { %v391_v60 = vpop.permute.xlu0 %390 }
 0x40f   :  { %v393_v61 = vmul.f32 %v1733_v59, %v391_v60 }
 0x411   :  { %395 = vrot.lane.b32.xlu1 %v393_v61, %s1813_s18  ;;  %v627_v61 = vld [vmem:[#allocation2 + $0x20] sm:$0xff] }
 0x483   :  { %v396_v62 = vpop.permute.xlu1 %395 }
 0x484   :  { %v398_v63 = vadd.f32 %v396_v62, %v309_v54 }
 0x486   :  { %1734 = vtanh.f32 %v398_v63 }
 0x490   :  { %v1735_v2 = vpop.eup %1734 }
 0x491   :  { %402 = vrot.lane.b32.xlu0 %v1735_v2, %s1814_s4 }
 0x503   :  { %v403_v4 = vpop.permute.xlu0 %402 }
 0x504   :  { %v405_v6 = vmul.f32 %v403_v4, %v400_v3 }
 0x506   :  { %v407_v7 = vadd.f32 %v406_v5, %v405_v6 }
 0x508   :  { %409 = vrot.lane.b32.xlu1 %v407_v7, %s1814_s4 }
 0x57a   :  { %v410_v14 = vpop.permute.xlu1 %409 }
 0x57b   :  { %413 = vst.msk [vmem:[#allocation3 + $0x8] sm:$0xff] %vm203_vm3, %v410_v14  ;;  %1563 = vmatmul.mubr.msk.f32.vlgmr.msra.gmra.mrb[4].mxu0 %vm203_vm3, %v410_v14 }
 0x57c   :  { %1681 = vmatpush3.bf16.msra.mxu0 %v1896_v9  ;;  %1584 = vmatprep.mubr.msk.f32.mxu0 %vm1811_vm1, %v1812_v16 }
 0x57d   :  { %1682 = vmatprep.subr.bf16.mxu0 %v1810_v10 }
 0x580   :  { %1684 = vmatpush3.bf16.msra.mxu0 %v1916_v15 }
 0x581   :  { %1691 = vmatprep.subr.bf16.mxu0 %v1810_v10 }
 0x64e   :  { %v484_v17 = vpop.f32.mrb[4].mxu0 }
 0x64f   :  { %v485_v18 = vadd.f32 %v1953_v30, %v484_v17  ;;  %v1564_v19 = vpop.f32.mrb[5].mxu0 }
 0x651   :  { %496 = vrot.lane.b32.xlu0 %v485_v18, %s1813_s18  ;;  %v488_v21 = vadd.f32 %v485_v18, %v415_v20 }
 0x653   :  { %v1425_v22 = vmul.f32 -1.442695, %v488_v21  ;;  %v733_v21 = vld [vmem:[#allocation2 + $0x28] sm:$0xff] }
 0x655   :  { %1736 = vpow2.f32 %v1425_v22 }
 0x65f   :  { %v1737_v23 = vpop.eup %1736 }
 0x660   :  { %v492_v24 = vadd.f32 1.0, %v1737_v23 }
 0x662   :  { %1738 = vrcp.f32 %v492_v24 }
 0x66c   :  { %v1739_v25 = vpop.eup %1738 }
 0x66d   :  { %v506_v32 = vsub.f32 1.0, %v1739_v25  ;;  %v512_v34 = vmul.f32 %v1739_v25, %v407_v7 }
 0x6c3   :  { %v497_v26 = vpop.permute.xlu0 %496 }
 0x6c4   :  { %v499_v27 = vmul.f32 %v1739_v25, %v497_v26 }
 0x6c6   :  { %501 = vrot.lane.b32.xlu1 %v499_v27, %s1813_s18 }
 0x738   :  { %v502_v28 = vpop.permute.xlu1 %501 }
 0x739   :  { %v504_v29 = vadd.f32 %v502_v28, %v415_v20 }
 0x73b   :  { %1740 = vtanh.f32 %v504_v29  ;;  %v1058_v29 = vld [vmem:[%s2162_s5] sm:$0xff] }
 0x745   :  { %v1741_v31 = vpop.eup %1740 }
 0x746   :  { %508 = vrot.lane.b32.xlu0 %v1741_v31, %s1814_s4  ;;  %v1059_v31 = vld [vmem:[%s2162_s5 + $0x8] sm:$0xff] }
 0x7b8   :  { %v509_v33 = vpop.permute.xlu0 %508 }
 0x7b9   :  { %v511_v35 = vmul.f32 %v509_v33, %v506_v32  ;;  %v1703_v32 = vpack.c.bf16 %v1059_v31, %v1058_v29 }
 0x7bb   :  { %v513_v36 = vadd.f32 %v512_v34, %v511_v35 }
 0x7bd   :  { %515 = vrot.lane.b32.xlu1 %v513_v36, %s1814_s4 }
 0x82f   :  { %v516_v37 = vpop.permute.xlu1 %515 }
 0x830   :  { %519 = vst.msk [vmem:[#allocation3 + $0x10] sm:$0xff] %vm203_vm3, %v516_v37  ;;  %1574 = vmatmul.mubr.msk.f32.vlgmr.msra.gmra.mrb[8].mxu1 %vm203_vm3, %v516_v37 }
 0x831   :  { %1687 = vmatpush3.bf16.msra.mxu1 %v1896_v9  ;;  %1595 = vmatprep.mubr.msk.f32.mxu1 %vm1811_vm1, %v1812_v16 }
 0x832   :  { %1688 = vmatprep.subr.bf16.mxu1 %v1810_v10 }
 0x835   :  { %1690 = vmatpush3.bf16.msra.mxu1 %v1916_v15 }
 0x836   :  { %1697 = vmatprep.subr.bf16.mxu1 %v1810_v10 }
 0x903   :  { %v590_v38 = vpop.f32.mrb[8].mxu1 }
 0x904   :  { %v591_v39 = vadd.f32 %v1953_v30, %v590_v38  ;;  %v1575_v40 = vpop.f32.mrb[9].mxu1 }
 0x905   :  { %v1061_v40 = vld [vmem:[%s2162_s5 + $0x18] sm:$0xff] }
 0x906   :  { %602 = vrot.lane.b32.xlu0 %v591_v39, %s1813_s18  ;;  %v594_v42 = vadd.f32 %v591_v39, %v521_v41  ;;  %v1060_v39 = vld [vmem:[%s2162_s5 + $0x10] sm:$0xff] }
 0x908   :  { %v1427_v43 = vmul.f32 -1.442695, %v594_v42 }
 0x90a   :  { %1742 = vpow2.f32 %v1427_v43  ;;  %v2054_v43 = vld [vmem:[#allocation3] sm:$0xff] }
 0x914   :  { %v1743_v44 = vpop.eup %1742 }
 0x915   :  { %v598_v45 = vadd.f32 1.0, %v1743_v44  ;;  %v2058_v44 = vld [vmem:[#allocation3 + $0x8] sm:$0xff] }
 0x917   :  { %1744 = vrcp.f32 %v598_v45  ;;  %v2062_v45 = vld [vmem:[#allocation3 + $0x10] sm:$0xff] }
 0x921   :  { %v1745_v46 = vpop.eup %1744 }
 0x922   :  { %v612_v52 = vsub.f32 1.0, %v1745_v46  ;;  %v618_v54 = vmul.f32 %v1745_v46, %v513_v36 }
 0x978   :  { %v603_v47 = vpop.permute.xlu0 %602 }
 0x979   :  { %v605_v48 = vmul.f32 %v1745_v46, %v603_v47 }
 0x97b   :  { %607 = vrot.lane.b32.xlu1 %v605_v48, %s1813_s18 }
 0x9ed   :  { %v608_v49 = vpop.permute.xlu1 %607 }
 0x9ee   :  { %v610_v50 = vadd.f32 %v608_v49, %v521_v41  ;;  %v1707_v41 = vpack.c.bf16 %v1061_v40, %v1060_v39 }
 0x9f0   :  { %1746 = vtanh.f32 %v610_v50 }
 0x9fa   :  { %v1747_v51 = vpop.eup %1746 }
 0x9fb   :  { %614 = vrot.lane.b32.xlu0 %v1747_v51, %s1814_s4 }
 0xa6d   :  { %v615_v53 = vpop.permute.xlu0 %614 }
 0xa6e   :  { %v617_v55 = vmul.f32 %v615_v53, %v612_v52 }
 0xa70   :  { %v619_v56 = vadd.f32 %v618_v54, %v617_v55 }
 0xa72   :  { %621 = vrot.lane.b32.xlu1 %v619_v56, %s1814_s4 }
 0xae4   :  { %v622_v57 = vpop.permute.xlu1 %621 }
 0xae5   :  { %625 = vst.msk [vmem:[#allocation3 + $0x18] sm:$0xff] %vm203_vm3, %v622_v57  ;;  %1585 = vmatmul.mubr.msk.f32.vlgmr.msra.gmra.mrb[6].mxu0 %vm203_vm3, %v622_v57 }
 0xae6   :  { %1693 = vmatpush3.bf16.msra.mxu0 %v1896_v9  ;;  %1606 = vmatprep.mubr.msk.f32.mxu0 %vm1811_vm1, %v1812_v16 }
 0xae7   :  { %1694 = vmatprep.subr.bf16.mxu0 %v1810_v10 }
 0xaea   :  { %1696 = vmatpush3.bf16.msra.mxu0 %v1916_v15 }
 0xaeb   :  { %1704 = vmatprep.subr.bf16.mxu0 %v1703_v32 }
 0xaec   :  { %v2066_v46 = vld [vmem:[#allocation3 + $0x18] sm:$0xff] }
 0xbb8   :  { %v696_v58 = vpop.f32.mrb[6].mxu0 }
 0xbb9   :  { %v697_v59 = vadd.f32 %v1953_v30, %v696_v58  ;;  %v1586_v60 = vpop.f32.mrb[7].mxu0  ;;  %v839_v58 = vld [vmem:[#allocation2 + $0x30] sm:$0xff] }
 0xbbb   :  { %708 = vrot.lane.b32.xlu0 %v697_v59, %s1813_s18  ;;  %v700_v62 = vadd.f32 %v697_v59, %v627_v61 }
 0xbbd   :  { %v1429_v63 = vmul.f32 -1.442695, %v700_v62 }
 0xbbf   :  { %1748 = vpow2.f32 %v1429_v63 }
 0xbc9   :  { %v1749_v0 = vpop.eup %1748 }
 0xbca   :  { %v704_v1 = vadd.f32 1.0, %v1749_v0 }
 0xbcc   :  { %1750 = vrcp.f32 %v704_v1 }
 0xbd6   :  { %v1751_v2 = vpop.eup %1750 }
 0xbd7   :  { %v718_v8 = vsub.f32 1.0, %v1751_v2  ;;  %v724_v12 = vmul.f32 %v1751_v2, %v619_v56 }
 0xc2d   :  { %v709_v3 = vpop.permute.xlu0 %708 }
 0xc2e   :  { %v711_v4 = vmul.f32 %v1751_v2, %v709_v3 }
 0xc30   :  { %713 = vrot.lane.b32.xlu1 %v711_v4, %s1813_s18 }
 0xca2   :  { %v714_v5 = vpop.permute.xlu1 %713 }
 0xca3   :  { %v716_v6 = vadd.f32 %v714_v5, %v627_v61 }
 0xca5   :  { %1752 = vtanh.f32 %v716_v6 }
 0xcaf   :  { %v1753_v7 = vpop.eup %1752 }
 0xcb0   :  { %720 = vrot.lane.b32.xlu0 %v1753_v7, %s1814_s4 }
 0xd22   :  { %v721_v11 = vpop.permute.xlu0 %720 }
 0xd23   :  { %v723_v13 = vmul.f32 %v721_v11, %v718_v8 }
 0xd25   :  { %v725_v14 = vadd.f32 %v724_v12, %v723_v13 }
 0xd27   :  { %727 = vrot.lane.b32.xlu1 %v725_v14, %s1814_s4 }
 0xd99   :  { %v728_v17 = vpop.permute.xlu1 %727 }
 0xd9a   :  { %731 = vst.msk [vmem:[#allocation3 + $0x20] sm:$0xff] %vm203_vm3, %v728_v17  ;;  %1596 = vmatmul.mubr.msk.f32.vlgmr.msra.gmra.mrb[10].mxu1 %vm203_vm3, %v728_v17 }
 0xd9b   :  { %1699 = vmatpush3.bf16.msra.mxu1 %v1896_v9  ;;  %1617 = vmatprep.mubr.msk.f32.mxu1 %vm1811_vm1, %v1812_v16 }
 0xd9c   :  { %1700 = vmatprep.subr.bf16.mxu1 %v1810_v10 }
 0xd9f   :  { %1702 = vmatpush3.bf16.msra.mxu1 %v1916_v15 }
 0xda0   :  { %1711 = vmatprep.subr.bf16.mxu1 %v1810_v10 }
 0xda1   :  { %v2070_v47 = vld [vmem:[#allocation3 + $0x20] sm:$0xff] }
 0xe6d   :  { %v802_v18 = vpop.f32.mrb[10].mxu1 }
 0xe6e   :  { %v803_v19 = vadd.f32 %v1953_v30, %v802_v18  ;;  %v1597_v20 = vpop.f32.mrb[11].mxu1 }
 0xe70   :  { %814 = vrot.lane.b32.xlu0 %v803_v19, %s1813_s18  ;;  %v806_v22 = vadd.f32 %v803_v19, %v733_v21  ;;  %v945_v19 = vld [vmem:[#allocation2 + $0x38] sm:$0xff] }
 0xe72   :  { %v1431_v23 = vmul.f32 -1.442695, %v806_v22 }
 0xe74   :  { %1754 = vpow2.f32 %v1431_v23 }
 0xe7e   :  { %v1755_v9 = vpop.eup %1754 }
 0xe7f   :  { %v810_v24 = vadd.f32 1.0, %v1755_v9 }
 0xe81   :  { %1756 = vrcp.f32 %v810_v24 }
 0xe8b   :  { %v1757_v25 = vpop.eup %1756 }
 0xe8c   :  { %v824_v34 = vsub.f32 1.0, %v1757_v25  ;;  %v830_v36 = vmul.f32 %v1757_v25, %v725_v14 }
 0xee2   :  { %v815_v26 = vpop.permute.xlu0 %814 }
 0xee3   :  { %v817_v27 = vmul.f32 %v1757_v25, %v815_v26 }
 0xee5   :  { %819 = vrot.lane.b32.xlu1 %v817_v27, %s1813_s18 }
 0xf57   :  { %v820_v15 = vpop.permute.xlu1 %819 }
 0xf58   :  { %v822_v28 = vadd.f32 %v820_v15, %v733_v21 }
 0xf5a   :  { %1758 = vtanh.f32 %v822_v28 }
 0xf64   :  { %v1759_v33 = vpop.eup %1758 }
 0xf65   :  { %826 = vrot.lane.b32.xlu0 %v1759_v33, %s1814_s4  ;;  %v1445_v33 = vld [vmem:[%s2164_s7] ss:$0 sm:$0xff] }
 0xfd7   :  { %v827_v35 = vpop.permute.xlu0 %826 }
 0xfd8   :  { %v829_v37 = vmul.f32 %v827_v35, %v824_v34 }
 0xfda   :  { %v831_v38 = vadd.f32 %v830_v36, %v829_v37 }
 0xfdc   :  { %833 = vrot.lane.b32.xlu1 %v831_v38, %s1814_s4 }
0x104e   :  { %v834_v42 = vpop.permute.xlu1 %833 }
0x104f   :  { %837 = vst.msk [vmem:[#allocation3 + $0x28] sm:$0xff] %vm203_vm3, %v834_v42  ;;  %1607 = vmatmul.mubr.msk.f32.vlgmr.msra.gmra.mrb[8].mxu0 %vm203_vm3, %v834_v42 }
0x1050   :  { %1706 = vmatpush3.bf16.msra.mxu0 %v1703_v32  ;;  %1628 = vmatprep.mubr.msk.f32.mxu0 %vm203_vm3, %v2054_v43 }
0x1051   :  { %1708 = vmatprep.subr.bf16.mxu0 %v1707_v41 }
0x1054   :  { %1710 = vmatpush3.bf16.msra.mxu0 %v1707_v41 }
0x1056   :  { %v2074_v48 = vld [vmem:[#allocation3 + $0x28] sm:$0xff] }
0x1057   :  { %1629 = vmatmul.mubr.msk.f32.vlgmr.msra.gmra.mrb[10].mxu0 %vm203_vm3, %v2058_v44 }
0x1058   :  { %1631 = vmatprep.mubr.msk.f32.mxu0 %vm203_vm3, %v2062_v45 }
0x105b   :  { %1632 = vmatmul.mubr.msk.f32.gmra.mrb[12].mxu0 %vm203_vm3, %v2066_v46 }
0x105c   :  { %1634 = vmatprep.mubr.msk.f32.mxu0 %vm203_vm3, %v2070_v47 }
0x105f   :  { %1635 = vmatmul.mubr.msk.f32.gmra.mrb[14].mxu0 %vm203_vm3, %v2074_v48 }
0x1122   :  { %v908_v49 = vpop.f32.mrb[8].mxu0 }
0x1123   :  { %v909_v50 = vadd.f32 %v1953_v30, %v908_v49  ;;  %v1608_v51 = vpop.f32.mrb[9].mxu0 }
0x1125   :  { %920 = vrot.lane.b32.xlu0 %v909_v50, %s1813_s18  ;;  %v912_v59 = vadd.f32 %v909_v50, %v839_v58 }
0x1127   :  { %v1433_v60 = vmul.f32 -1.442695, %v912_v59 }
0x1129   :  { %1760 = vpow2.f32 %v1433_v60 }
0x112a   :  { %v2080_v52 = vpop.f32.mrb[10].mxu0 }
0x112b   :  { %v1159_v53 = vpop.f32.mrb[11].mxu0 }
0x112e   :  { %v1633_v54 = vpop.f32.mrb[12].mxu0 }
0x112f   :  { %v1169_v55 = vpop.f32.mrb[13].mxu0 }
0x1132   :  { %v1636_v56 = vpop.f32.mrb[14].mxu0 }
0x1133   :  { %v2082_v57 = vpop.f32.mrb[15].mxu0  ;;  %v1761_v61 = vpop.eup %1760 }
0x1134   :  { %v916_v62 = vadd.f32 1.0, %v1761_v61 }
0x1136   :  { %1762 = vrcp.f32 %v916_v62 }
0x1140   :  { %v1763_v63 = vpop.eup %1762 }
0x1141   :  { %v930_v5 = vsub.f32 1.0, %v1763_v63  ;;  %v936_v7 = vmul.f32 %v1763_v63, %v831_v38 }
0x1197   :  { %v921_v0 = vpop.permute.xlu0 %920 }
0x1198   :  { %v923_v1 = vmul.f32 %v1763_v63, %v921_v0 }
0x119a   :  { %925 = vrot.lane.b32.xlu1 %v923_v1, %s1813_s18 }
0x120c   :  { %v926_v2 = vpop.permute.xlu1 %925 }
0x120d   :  { %v928_v3 = vadd.f32 %v926_v2, %v839_v58 }
0x120f   :  { %1764 = vtanh.f32 %v928_v3 }
0x1219   :  { %v1765_v4 = vpop.eup %1764 }
0x121a   :  { %932 = vrot.lane.b32.xlu0 %v1765_v4, %s1814_s4 }
0x128c   :  { %v933_v6 = vpop.permute.xlu0 %932 }
0x128d   :  { %v935_v8 = vmul.f32 %v933_v6, %v930_v5 }
0x128f   :  { %v937_v11 = vadd.f32 %v936_v7, %v935_v8 }
0x1291   :  { %939 = vrot.lane.b32.xlu1 %v937_v11, %s1814_s4 }
0x1303   :  { %v940_v12 = vpop.permute.xlu1 %939 }
0x1304   :  { %943 = vst.msk [vmem:[#allocation3 + $0x30] sm:$0xff] %vm203_vm3, %v940_v12  ;;  %1618 = vmatmul.mubr.msk.f32.vlgmr.msra.gmra.mrb[12].mxu1 %vm203_vm3, %v940_v12 }
0x1305   :  { %1648 = vmatprep.mubr.msk.f32.mxu1 %vm1811_vm1, %v1812_v16 }
0x130b   :  { %v2091_v13 = vld [vmem:[#allocation3 + $0x30] sm:$0xff] }
0x130c   :  { %1637 = vmatprep.mubr.msk.f32.mxu0 %vm203_vm3, %v2091_v13 }
0x13d7   :  { %v1014_v14 = vpop.f32.mrb[12].mxu1 }
0x13d8   :  { %v1015_v17 = vadd.f32 %v1953_v30, %v1014_v14  ;;  %v1619_v18 = vpop.f32.mrb[13].mxu1  ;;  %v1436_v30 = vld [vmem:[%s2163_s6] ss:$0 sm:$0xff] }
0x13d9   :  { %v1160_v15 = vadd.f32 %v1436_v30, %v1159_v53  ;;  %v1170_v28 = vadd.f32 %v1436_v30, %v1169_v55  ;;  %v1175_v29 = vadd.f32 %v1633_v54, %v1436_v30  ;;  %v1185_v31 = vadd.f32 %v1636_v56, %v1436_v30  ;;  %v1316_v18 = vld [vmem:[%s2165_s8 + $0x8] sm:$0xff] }
0x13da   :  { %1026 = vrot.lane.b32.xlu0 %v1015_v17, %s1813_s18  ;;  %v1018_v20 = vadd.f32 %v1015_v17, %v945_v19  ;;  %v1165_v58 = vadd.f32 %v2080_v52, %v1436_v30  ;;  %v1180_v59 = vadd.f32 %v1436_v30, %v2082_v57  ;;  %v1315_v17 = vld [vmem:[%s2165_s8] sm:$0xff] }
0x13dc   :  { %v1435_v21 = vmul.f32 -1.442695, %v1018_v20  ;;  %v1712_v20 = vpack.c.bf16 %v1316_v18, %v1315_v17 }
0x13de   :  { %1766 = vpow2.f32 %v1435_v21  ;;  %v1318_v21 = vld [vmem:[%s2165_s8 + $0x18] sm:$0xff]  ;;  %1713 = vmatpush3.bf16.msra.mxu1 %v1712_v20 }
0x13df   :  { %1714 = vmatprep.subr.bf16.mxu1 %v1810_v10 }
0x13e8   :  { %v1767_v22 = vpop.eup %1766 }
0x13e9   :  { %v1022_v23 = vadd.f32 1.0, %v1767_v22 }
0x13eb   :  { %1768 = vrcp.f32 %v1022_v23 }
0x13f5   :  { %v1769_v9 = vpop.eup %1768 }
0x13f6   :  { %v1036_v51 = vsub.f32 1.0, %v1769_v9  ;;  %v1042_v54 = vmul.f32 %v1769_v9, %v937_v11 }
0x144c   :  { %v1027_v16 = vpop.permute.xlu0 %1026 }
0x144d   :  { %v1029_v24 = vmul.f32 %v1769_v9, %v1027_v16 }
0x144f   :  { %1031 = vrot.lane.b32.xlu1 %v1029_v24, %s1813_s18 }
0x14c1   :  { %v1032_v25 = vpop.permute.xlu1 %1031 }
0x14c2   :  { %v1034_v26 = vadd.f32 %v1032_v25, %v945_v19  ;;  %v1317_v19 = vld [vmem:[%s2165_s8 + $0x10] sm:$0xff] }
0x14c3   :  { %v1715_v22 = vpack.c.bf16 %v1318_v21, %v1317_v19 }
0x14c4   :  { %1770 = vtanh.f32 %v1034_v26 }
0x14c5   :  { %1772 = vtanh.f32 %v1160_v15  ;;  %1716 = vmatpush3.bf16.msra.mxu1 %v1715_v22 }
0x14c6   :  { %1774 = vtanh.f32 %v1170_v28 }
0x14c7   :  { %1776 = vtanh.f32 %v1175_v29 }
0x14c8   :  { %1778 = vtanh.f32 %v1185_v31 }
0x14c9   :  { %1780 = vtanh.f32 %v1165_v58 }
0x14ca   :  { %1782 = vtanh.f32 %v1180_v59 }
0x14ce   :  { %v1771_v27 = vpop.eup %1770 }
0x14cf   :  { %1038 = vrot.lane.b32.xlu0 %v1771_v27, %s1814_s4  ;;  %v1773_v32 = vpop.eup %1772 }
0x14d0   :  { %v1213_v34 = vmul.f32 %v1773_v32, %v1445_v33  ;;  %v1775_v35 = vpop.eup %1774 }
0x14d1   :  { %v1215_v37 = vmul.f32 %v1775_v35, %v1445_v33  ;;  %v1777_v38 = vpop.eup %1776 }
0x14d2   :  { %v1221_v36 = vsel %vm203_vm3, %v1213_v34, 0.0  ;;  %v1216_v40 = vmul.f32 %v1777_v38, %v1445_v33  ;;  %v1779_v41 = vpop.eup %1778 }
0x14d3   :  { %v1227_v39 = vsel %vm203_vm3, %v1215_v37, 0.0  ;;  %v1218_v49 = vmul.f32 %v1779_v41, %v1445_v33  ;;  %v1781_v60 = vpop.eup %1780 }
0x14d4   :  { %v1230_v42 = vsel %vm203_vm3, %v1216_v40, 0.0  ;;  %v1214_v61 = vmul.f32 %v1781_v60, %v1445_v33  ;;  %v1783_v62 = vpop.eup %1782 }
0x14d5   :  { %v1236_v50 = vsel %vm203_vm3, %v1218_v49, 0.0  ;;  %v1217_v0 = vmul.f32 %v1783_v62, %v1445_v33 }
0x14d6   :  { %v1224_v63 = vsel %vm203_vm3, %v1214_v61, 0.0 }
0x14d7   :  { %v1233_v1 = vsel %vm203_vm3, %v1217_v0, 0.0 }
0x14ee   :  { %1222 = vadd.xlane.f32.xlu0 %v1221_v36 }
0x14f2   :  { %1228 = vadd.xlane.f32.xlu0 %v1227_v39 }
0x14f6   :  { %1231 = vadd.xlane.f32.xlu0 %v1230_v42 }
0x14fa   :  { %1237 = vadd.xlane.f32.xlu0 %v1236_v50 }
0x1541   :  { %v1039_v53 = vpop.permute.xlu0 %1038 }
0x1542   :  { %v1041_v55 = vmul.f32 %v1039_v53, %v1036_v51 }
0x1544   :  { %v1043_v56 = vadd.f32 %v1042_v54, %v1041_v55 }
0x1546   :  { %1045 = vrot.lane.b32.xlu1 %v1043_v56, %s1814_s4 }
0x156a   :  { %1225 = vadd.xlane.f32.xlu1 %v1224_v63 }
0x156e   :  { %1234 = vadd.xlane.f32.xlu1 %v1233_v1 }
0x157b   :  { %v1223_v23 = vpop.xlane.xlu0 %1222 }
0x157f   :  { %v1229_v9 = vpop.xlane.xlu0 %1228 }
0x1583   :  { %v1232_v16 = vpop.xlane.xlu0 %1231 }
0x1587   :  { %v1238_v25 = vpop.xlane.xlu0 %1237 }
0x15b8   :  { %v1046_v2 = vpop.permute.xlu1 %1045 }
0x15b9   :  { %1049 = vst.msk [vmem:[#allocation3 + $0x38] sm:$0xff] %vm203_vm3, %v1046_v2 }
0x15c0   :  { %v2115_v3 = vld [vmem:[#allocation3 + $0x38] sm:$0xff] }
0x15c1   :  { %1638 = vmatmul.mubr.msk.f32.gmra.mrb[16].mxu0 %vm203_vm3, %v2115_v3 }
0x15f7   :  { %v1226_v24 = vpop.xlane.xlu1 %1225 }
0x15f8   :  { %v1246_v29 = vmax.f32 %v1226_v24, %v1238_v25 }
0x15fb   :  { %v1235_v26 = vpop.xlane.xlu1 %1234 }
0x15fc   :  { %v1245_v27 = vmax.f32 %v1223_v23, %v1235_v26 }
0x15fe   :  { %v1249_v32 = vmax.f32 %v1245_v27, %v1246_v29 }
0x1694   :  { %v1639_v52 = vpop.f32.mrb[16].mxu0 }
0x1695   :  { %v1195_v57 = vadd.f32 %v1639_v52, %v1436_v30  ;;  %v1189_v4 = vpop.f32.mrb[17].mxu0 }
0x1696   :  { %v1190_v5 = vadd.f32 %v1436_v30, %v1189_v4 }
0x1697   :  { %1784 = vtanh.f32 %v1195_v57 }
0x1698   :  { %1786 = vtanh.f32 %v1190_v5 }
0x16a1   :  { %v1785_v6 = vpop.eup %1784 }
0x16a2   :  { %v1787_v7 = vpop.eup %1786  ;;  %v1220_v8 = vmul.f32 %v1785_v6, %v1445_v33 }
0x16a3   :  { %v1219_v11 = vmul.f32 %v1787_v7, %v1445_v33 }
0x16a4   :  { %v1242_v12 = vsel %vm203_vm3, %v1220_v8, 0.0 }
0x16a5   :  { %1243 = vadd.xlane.f32.xlu0 %v1242_v12  ;;  %v1239_v14 = vsel %vm203_vm3, %v1219_v11, 0.0 }
0x16a6   :  { %1240 = vadd.xlane.f32.xlu1 %v1239_v14 }
0x1732   :  { %v1244_v30 = vpop.xlane.xlu0 %1243 }
0x1733   :  { %v1248_v15 = vmax.f32 %v1232_v16, %v1244_v30  ;;  %v1241_v28 = vpop.xlane.xlu1 %1240 }
0x1734   :  { %v1247_v31 = vmax.f32 %v1229_v9, %v1241_v28 }
0x1736   :  { %v1250_v33 = vmax.f32 %v1247_v31, %v1248_v15 }
0x1738   :  { %v1251_v34 = vmax.f32 %v1249_v32, %v1250_v33 }
0x173a   :  { %v1252_v35 = vsub.f32 %v1223_v23, %v1251_v34  ;;  %v1253_v36 = vsub.f32 %v1226_v24, %v1251_v34  ;;  %v1254_v37 = vsub.f32 %v1229_v9, %v1251_v34  ;;  %v1255_v10 = vsub.f32 %v1232_v16, %v1251_v34 }
0x173b   :  { %v1256_v40 = vsub.f32 %v1235_v26, %v1251_v34  ;;  %v1257_v42 = vsub.f32 %v1238_v25, %v1251_v34  ;;  %v1258_v50 = vsub.f32 %v1241_v28, %v1251_v34  ;;  %v1259_v53 = vsub.f32 %v1244_v30, %v1251_v34 }
0x173c   :  { %v1260_v38 = vmul.f32 1.442695, %v1252_v35  ;;  %v1262_v39 = vmul.f32 1.442695, %v1253_v36  ;;  %v1264_v41 = vmul.f32 1.442695, %v1254_v37 }
0x173d   :  { %v1266_v49 = vmul.f32 1.442695, %v1255_v10  ;;  %v1268_v51 = vmul.f32 1.442695, %v1256_v40  ;;  %v1270_v54 = vmul.f32 1.442695, %v1257_v42 }
0x173e   :  { %1788 = vpow2.f32 %v1260_v38  ;;  %v1272_v55 = vmul.f32 1.442695, %v1258_v50  ;;  %v1274_v56 = vmul.f32 1.442695, %v1259_v53 }
0x173f   :  { %1790 = vpow2.f32 %v1262_v39 }
0x1740   :  { %1792 = vpow2.f32 %v1264_v41 }
0x1741   :  { %1794 = vpow2.f32 %v1266_v49 }
0x1742   :  { %1796 = vpow2.f32 %v1268_v51 }
0x1743   :  { %1798 = vpow2.f32 %v1270_v54 }
0x1744   :  { %1800 = vpow2.f32 %v1272_v55 }
0x1745   :  { %1802 = vpow2.f32 %v1274_v56 }
0x1748   :  { %v1789_v58 = vpop.eup %1788 }
0x1749   :  { %v1791_v59 = vpop.eup %1790 }
0x174a   :  { %v1276_v60 = vadd.f32 %v1791_v59, %v1789_v58  ;;  %v1793_v61 = vpop.eup %1792 }
0x174b   :  { %v1795_v63 = vpop.eup %1794 }
0x174c   :  { %v1277_v62 = vadd.f32 %v1793_v61, %v1276_v60  ;;  %v1797_v1 = vpop.eup %1796 }
0x174d   :  { %v1799_v52 = vpop.eup %1798 }
0x174e   :  { %v1278_v0 = vadd.f32 %v1795_v63, %v1277_v62  ;;  %v1801_v4 = vpop.eup %1800 }
0x174f   :  { %v1803_v6 = vpop.eup %1802 }
0x1750   :  { %v1279_v2 = vadd.f32 %v1797_v1, %v1278_v0 }
0x1752   :  { %v1280_v57 = vadd.f32 %v1799_v52, %v1279_v2 }
0x1754   :  { %v1281_v5 = vadd.f32 %v1801_v4, %v1280_v57 }
0x1756   :  { %v1282_v7 = vadd.f32 %v1803_v6, %v1281_v5 }
0x1758   :  { %1804 = vrcp.f32 %v1282_v7 }
0x1762   :  { %v1805_v8 = vpop.eup %1804 }
0x1763   :  { %v1284_v11 = vmul.f32 %v1805_v8, %v1789_v58  ;;  %v1285_v12 = vmul.f32 %v1805_v8, %v1791_v59  ;;  %v1286_v14 = vmul.f32 %v1805_v8, %v1793_v61  ;;  %v1287_v17 = vmul.f32 %v1805_v8, %v1795_v63 }
0x1764   :  { %v1288_v18 = vmul.f32 %v1805_v8, %v1797_v1  ;;  %v1289_v22 = vmul.f32 %v1805_v8, %v1799_v52  ;;  %v1290_v25 = vmul.f32 %v1805_v8, %v1801_v4  ;;  %v1291_v15 = vmul.f32 %v1805_v8, %v1803_v6 }
0x1765   :  { %v1292_v19 = vmul.f32 %v1284_v11, %v2054_v43  ;;  %v1293_v20 = vmul.f32 %v1285_v12, %v2058_v44  ;;  %v1294_v21 = vmul.f32 %v1286_v14, %v2062_v45  ;;  %v1295_v23 = vmul.f32 %v1287_v17, %v2066_v46 }
0x1766   :  { %v1296_v26 = vmul.f32 %v1288_v18, %v2070_v47  ;;  %v1297_v43 = vmul.f32 %v1289_v22, %v2074_v48  ;;  %v1298_v28 = vmul.f32 %v1290_v25, %v2091_v13  ;;  %v1299_v31 = vmul.f32 %v1291_v15, %v2115_v3  ;;  %v1446_v48 = vld [vmem:[%s2166_s9] ss:$0 sm:$0xff] }
0x1767   :  { %v1300_v9 = vsel %vm203_vm3, %v1292_v19, 0.0  ;;  %v1301_v16 = vsel %vm203_vm3, %v1293_v20, 0.0  ;;  %v1303_v27 = vsel %vm203_vm3, %v1294_v21, 0.0  ;;  %v1305_v44 = vsel %vm203_vm3, %v1295_v23, 0.0 }
0x1768   :  { %v1302_v24 = vadd.f32 %v1301_v16, %v1300_v9  ;;  %v1307_v46 = vsel %vm203_vm3, %v1296_v26, 0.0  ;;  %v1309_v32 = vsel %vm203_vm3, %v1297_v43, 0.0  ;;  %v1311_v47 = vsel %vm203_vm3, %v1298_v28, 0.0 }
0x1769   :  { %v1313_v35 = vsel %vm203_vm3, %v1299_v31, 0.0 }
0x176a   :  { %v1304_v30 = vadd.f32 %v1303_v27, %v1302_v24 }
0x176c   :  { %v1306_v45 = vadd.f32 %v1305_v44, %v1304_v30 }
0x176e   :  { %v1308_v29 = vadd.f32 %v1307_v46, %v1306_v45 }
0x1770   :  { %v1310_v33 = vadd.f32 %v1309_v32, %v1308_v29 }
0x1772   :  { %v1312_v34 = vadd.f32 %v1311_v47, %v1310_v33 }
0x1774   :  { %v1314_v36 = vadd.f32 %v1313_v35, %v1312_v34 }
0x1776   :  { %1649 = vmatmul.mubr.msk.f32.vlgmr.msra.gmra.mrb[14].mxu1 %vm203_vm3, %v1314_v36 }
0x1849   :  { %v1395_v13 = vpop.f32.mrb[14].mxu1 }
0x184a   :  { %v1396_v37 = vadd.f32 %v1446_v48, %v1395_v13  ;;  %v1650_v10 = vpop.f32.mrb[15].mxu1 }
0x184c   :  { %v1448_v38 = vmul.f32 -1.442695, %v1396_v37 }
0x184e   :  { %1806 = vpow2.f32 %v1448_v38 }
0x1858   :  { %v1807_v3 = vpop.eup %1806 }
0x1859   :  { %v1402_v39 = vadd.f32 1.0, %v1807_v3 }
0x185b   :  { %1808 = vrcp.f32 %v1402_v39 }
0x1865   :  { %v1809_v40 = vpop.eup %1808 }
0x1866   :  { %1406 = vst.msk [vmem:[%s2167_s10] sm:$0xff] %vm1405_vm4, %v1809_v40 }

</bundles_post_ra>
